<compile_context>
chip_gen: v7x
topology: tpu7x:2x2x1
jax: 0.10.0
libtpu: 0.0.40
codegen_flags: <defaults>
</compile_context>

<pallas_src>
import functools

import jax
import jax.numpy as jnp
from jax import lax
from jax.experimental import pallas as pl
from jax.experimental.pallas import tpu as pltpu

_EPS = 1e-5


# ----------------------------- fused kernel -------------------------------- #

def _fused_kernel(x_ref, w1_ref, g1_ref, be1_ref,
                  w2_ref, g2_ref, be2_ref,
                  wr_ref, gr_ref, ber_ref,
                  out_ref, *, num_blocks, has_proj):
    # x_ref : (B, L, C)   input, already channel-padded to C = hidden_dim (f32)
    # w1/w2 : (nb, 3*C, C) bf16, tap-major stacked conv weights (padded in-chans)
    # g*/be*: (nb, 1, C) f32 BatchNorm gamma / beta
    # wr    : (C, C) bf16 1x1 projection weight (block 0 only); gr/ber: (1, C) f32
    # out_ref: (B, L, C) f32
    B, L, C = x_ref.shape
    BL = B * L
    inv_n = 1.0 / float(BL)

    # Per-batch boundary masks for the 'same' padding of the k=3 conv.
    # Hoisted once; reused by every conv (rolled boundary rows must be zero).
    l_idx = lax.broadcasted_iota(jnp.int32, (B, L, C), 1)
    not_first = l_idx > 0
    not_last = l_idx < (L - 1)

    def conv3(x3d, w_bf16):
        # taps: x[l-1], x[l], x[l+1] via XLU sublane rolls + boundary zero-mask,
        # then ONE MXU matmul with contraction depth 3*C (bf16 operands, f32 acc).
        xm1 = jnp.where(not_first, pltpu.roll(x3d, 1, 1), 0.0)
        xp1 = jnp.where(not_last, pltpu.roll(x3d, L - 1, 1), 0.0)
        xcat = jnp.concatenate([xm1, x3d, xp1], axis=-1).astype(jnp.bfloat16)
        return jnp.dot(xcat.reshape(BL, 3 * C), w_bf16,
                       preferred_element_type=jnp.float32)          # (BL, C) f32

    def bn(y2d, g_row, b_row):
        # training-mode BatchNorm1d, single-pass stats (biased variance).
        s = jnp.sum(y2d, axis=0, keepdims=True)
        ss = jnp.sum(y2d * y2d, axis=0, keepdims=True)
        mean = s * inv_n
        var = ss * inv_n - mean * mean
        scale = g_row * lax.rsqrt(var + _EPS)
        return y2d * scale + (b_row - mean * scale)

    def resblock(cur2d, w1, g1, be1, w2, g2, be2, res2d):
        h = jnp.maximum(bn(conv3(cur2d.reshape(B, L, C), w1), g1, be1), 0.0)
        h2 = bn(conv3(h.reshape(B, L, C), w2), g2, be2)
        return jnp.maximum(h2 + res2d, 0.0)

    x0 = x_ref[...]
    cur = x0.reshape(BL, C)

    # Block 0 (may carry the 1x1 projection residual).
    if has_proj:
        r = jnp.dot(cur.astype(jnp.bfloat16), wr_ref[...],
                    preferred_element_type=jnp.float32)
        r = bn(r, gr_ref[...], ber_ref[...])
    else:
        r = cur
    cur = resblock(cur, w1_ref[0], g1_ref[0], be1_ref[0],
                   w2_ref[0], g2_ref[0], be2_ref[0], r)

    # Remaining identity-residual blocks.
    if num_blocks <= 6:
        for blk in range(1, num_blocks):          # small depth: unroll for LLO
            cur = resblock(cur, w1_ref[blk], g1_ref[blk], be1_ref[blk],
                           w2_ref[blk], g2_ref[blk], be2_ref[blk], cur)
    else:
        def body(blk, c):                          # deep stacks: rolled loop,
            return resblock(c,                     # dynamic weight indexing
                            w1_ref[blk], g1_ref[blk], be1_ref[blk],
                            w2_ref[blk], g2_ref[blk], be2_ref[blk], c)
        cur = lax.fori_loop(1, num_blocks, body, cur)

    out_ref[...] = cur.reshape(B, L, C)


def _fused_resblocks(x, pk, *, has_proj):
    B, L, C = x.shape
    nb = pk["w1"].shape[0]
    kernel = functools.partial(_fused_kernel, num_blocks=nb, has_proj=has_proj)

    inputs = (x, pk["w1"], pk["g1"], pk["be1"],
              pk["w2"], pk["g2"], pk["be2"],
              pk["wr"], pk["gr"], pk["ber"])

    # Size the scoped-VMEM limit to the actual resident footprint (+ headroom
    # for in-kernel temporaries), clamped to physical VMEM.
    act_bytes = B * L * C * 4
    io_bytes = sum(int(a.size) * a.dtype.itemsize for a in inputs) + act_bytes
    needed = 2 * io_bytes + 16 * act_bytes + (4 << 20)
    try:
        cap = int(pltpu.get_tpu_info().vmem_capacity_bytes)
    except Exception:
        cap = 64 << 20
    vmem_limit = int(min(max(needed, 32 << 20), cap - (2 << 20)))

    return pl.pallas_call(
        kernel,
        out_shape=jax.ShapeDtypeStruct((B, L, C), jnp.float32),
        in_specs=[pl.BlockSpec(a.shape) for a in inputs],
        out_specs=pl.BlockSpec((B, L, C)),
        compiler_params=pltpu.CompilerParams(vmem_limit_bytes=vmem_limit),
    )(*inputs)


# ------------------------------ model glue --------------------------------- #

@jax.jit
def original_forward(x_ncl, packed):
    """x_ncl: (B, Cin, L)  ->  (B, hidden, L), matching the PyTorch module."""
    B, Cin, L = x_ncl.shape
    C = packed["w1"].shape[-1]
    assert Cin <= C
    assert L % 8 == 0, "seq_len must be a multiple of 8 for aligned VMEM tiling"
    x = jnp.transpose(x_ncl, (0, 2, 1)).astype(jnp.float32)      # NCL -> NLC (once)
    if Cin < C:
        x = jnp.pad(x, ((0, 0), (0, 0), (0, C - Cin)))           # channel pad (once)
    y = _fused_resblocks(x, packed, has_proj=(Cin != C))
    return jnp.transpose(y, (0, 2, 1))                           # NLC -> NCL (once)


def pack_params(params, in_channels, hidden_dim):
    """One-time host-side re-layout: tap-major stacked (3*C, C) bf16 conv
    weights (input channels zero-padded to hidden_dim), gamma/beta as (1, C)
    f32 rows, all blocks stacked for in-kernel block indexing.  Conv biases are
    NOT packed: they are exactly cancelled by training-mode BatchNorm."""
    assert in_channels <= hidden_dim
    C = hidden_dim

    def conv_stacked(w, cin):                    # torch (Cout, Cin, 3) -> (3*C, Cout)
        wt = jnp.transpose(w, (2, 1, 0)).astype(jnp.float32)      # (3, cin, Cout)
        if cin < C:
            wt = jnp.pad(wt, ((0, 0), (0, C - cin), (0, 0)))
        return wt.reshape(3 * C, C).astype(jnp.bfloat16)

    row = lambda v: v.reshape(1, C).astype(jnp.float32)

    W1, G1, BE1, W2, G2, BE2 = ([] for _ in range(6))
    for i, p in enumerate(params):
        cin = in_channels if i == 0 else C
        W1.append(conv_stacked(p["w1"], cin))
        G1.append(row(p["g1"])); BE1.append(row(p["be1"]))
        W2.append(conv_stacked(p["w2"], C))
        G2.append(row(p["g2"])); BE2.append(row(p["be2"]))

    packed = {"w1": jnp.stack(W1), "g1": jnp.stack(G1), "be1": jnp.stack(BE1),
              "w2": jnp.stack(W2), "g2": jnp.stack(G2), "be2": jnp.stack(BE2)}

    if "wr" in params[0]:
        wr = jnp.transpose(params[0]["wr"][:, :, 0]).astype(jnp.float32)  # (cin, C)
        wr = jnp.pad(wr, ((0, C - in_channels), (0, 0)))
        packed["wr"] = wr.astype(jnp.bfloat16)
        packed["gr"] = row(params[0]["gr"])
        packed["ber"] = row(params[0]["ber"])
    else:  # placeholders; never read when has_proj=False
        packed["wr"] = jnp.zeros((C, C), jnp.bfloat16)
        packed["gr"] = jnp.ones((1, C), jnp.float32)
        packed["ber"] = jnp.zeros((1, C), jnp.float32)
    return packed


# ------------------------- param init (torch layout) ------------------------ #

def init_resblock_params(key, cin, cout):
    ks = jax.random.split(key, 12)
    s1 = 1.0 / jnp.sqrt(jnp.float32(cin * 3))
    s2 = 1.0 / jnp.sqrt(jnp.float32(cout * 3))
    p = {
        "w1": jax.random.normal(ks[0], (cout, cin, 3), jnp.float32) * s1,
        "b1": jax.random.normal(ks[1], (cout,), jnp.float32) * s1,
        "g1": 1.0 + 0.1 * jax.random.normal(ks[2], (cout,), jnp.float32),
        "be1": 0.1 * jax.random.normal(ks[3], (cout,), jnp.float32),
        "w2": jax.random.normal(ks[4], (cout, cout, 3), jnp.float32) * s2,
        "b2": jax.random.normal(ks[5], (cout,), jnp.float32) * s2,
        "g2": 1.0 + 0.1 * jax.random.normal(ks[6], (cout,), jnp.float32),
        "be2": 0.1 * jax.random.normal(ks[7], (cout,), jnp.float32),
    }
    if cin != cout:  # stride is always 1 in `Original`
        sr = 1.0 / jnp.sqrt(jnp.float32(cin))
        p["wr"] = jax.random.normal(ks[8], (cout, cin, 1), jnp.float32) * sr
        p["br"] = jax.random.normal(ks[9], (cout,), jnp.float32) * sr
        p["gr"] = 1.0 + 0.1 * jax.random.normal(ks[10], (cout,), jnp.float32)
        p["ber"] = 0.1 * jax.random.normal(ks[11], (cout,), jnp.float32)
    return p


def init_original_params(key, in_channels, hidden_dim, num_blocks):
    keys = jax.random.split(key, num_blocks + 1)
    params = [init_resblock_params(keys[0], in_channels, hidden_dim)]
    for i in range(num_blocks):
        params.append(init_resblock_params(keys[i + 1], hidden_dim, hidden_dim))
    return params


# -------------------------- pure-JAX reference ------------------------------ #

def _ref_forward(x_ncl, params):
    x = jnp.transpose(x_ncl, (0, 2, 1)).astype(jnp.float32)      # (B, L, C)

    def conv(x, w, b):                                           # torch (Cout, Cin, K)
        K = w.shape[2]
        p = (K - 1) // 2
        L = x.shape[1]
        xp = jnp.pad(x, ((0, 0), (p, p), (0, 0)))
        wt = jnp.transpose(w, (2, 1, 0))                          # (K, Cin, Cout)
        y = b.reshape(1, 1, -1)
        for t in range(K):
            y = y + jnp.einsum("blc,co->blo", xp[:, t:t + L, :], wt[t],
                               precision=jax.lax.Precision.HIGHEST)
        return y

    def bn(y, g, be):
        mean = jnp.mean(y, axis=(0, 1), keepdims=True)
        var = jnp.mean(jnp.square(y - mean), axis=(0, 1), keepdims=True)
        return (y - mean) * jax.lax.rsqrt(var + _EPS) * g + be

    for p in params:
        h = jax.nn.relu(bn(conv(x, p["w1"], p["b1"]), p["g1"], p["be1"]))
        h = bn(conv(h, p["w2"], p["b2"]), p["g2"], p["be2"])
        r = bn(conv(x, p["wr"], p["br"]), p["gr"], p["ber"]) if "wr" in p else x
        x = jax.nn.relu(h + r)
    return jnp.transpose(x, (0, 2, 1))


if __name__ == "__main__":
    # Shapes consistent with the module: Original(in_channels=8, hidden_dim=32, num_blocks=2)
    B, CIN, L, HIDDEN, NUM_BLOCKS = 2, 8, 16, 32, 2

    key = jax.random.PRNGKey(0)
    kx, kp = jax.random.split(key)
    x = jax.random.normal(kx, (B, CIN, L), jnp.float32)          # (batch, num_in_feats, seq_len)
    params = init_original_params(kp, CIN, HIDDEN, NUM_BLOCKS)
    packed = pack_params(params, CIN, HIDDEN)                    # one-time weight re-layout

    out = jax.block_until_ready(original_forward(x, packed))
    assert out.shape == (B, HIDDEN, L), out.shape
    assert bool(jnp.all(jnp.isfinite(out)))

    # f32 HIGHEST-precision reference; kernel uses bf16 MXU operands (f32 accum),
    # so compare with a norm-based tolerance.
    ref = _ref_forward(x, params)
    rel = float(jnp.linalg.norm(out - ref) / (jnp.linalg.norm(ref) + 1e-12))
    max_abs = float(jnp.max(jnp.abs(out - ref)))
    assert rel < 3e-2 and max_abs < 1.5e-1, (rel, max_abs)

    print("KERNEL_OK")
</pallas_src>

<mosaic_0001>
module attributes {stable_mosaic.version = 11 : i64} {
  func.func @_fused_kernel(%arg0: memref<2x16x32xf32, #tpu.memory_space<vmem>>, %arg1: memref<3x96x32xbf16, #tpu.memory_space<vmem>>, %arg2: memref<3x1x32xf32, #tpu.memory_space<vmem>>, %arg3: memref<3x1x32xf32, #tpu.memory_space<vmem>>, %arg4: memref<3x96x32xbf16, #tpu.memory_space<vmem>>, %arg5: memref<3x1x32xf32, #tpu.memory_space<vmem>>, %arg6: memref<3x1x32xf32, #tpu.memory_space<vmem>>, %arg7: memref<32x32xbf16, #tpu.memory_space<vmem>>, %arg8: memref<1x32xf32, #tpu.memory_space<vmem>>, %arg9: memref<1x32xf32, #tpu.memory_space<vmem>>, %arg10: memref<2x16x32xf32, #tpu.memory_space<vmem>>) attributes {dimension_semantics = [], scalar_prefetch = 0 : i64, scratch_operands = 0 : i64, tpu.core_type = #tpu.core_type<tc>} {
    %0 = tpu.iota {dimensions = array<i32: 1>} : vector<2x16x32xi32>
    %c0_i32 = arith.constant 0 : i32
    %1 = vector.broadcast %c0_i32 : i32 to vector<2x16x32xi32>
    %2 = arith.cmpi sgt, %0, %1 : vector<2x16x32xi32>
    %c15_i32 = arith.constant 15 : i32
    %3 = vector.broadcast %c15_i32 : i32 to vector<2x16x32xi32>
    %4 = arith.cmpi slt, %0, %3 : vector<2x16x32xi32>
    %c0 = arith.constant 0 : index
    %c0_0 = arith.constant 0 : index
    %c0_1 = arith.constant 0 : index
    %5 = vector.load %arg0[%c0, %c0_0, %c0_1] : memref<2x16x32xf32, #tpu.memory_space<vmem>>, vector<2x16x32xf32>
    %6 = vector.shape_cast %5 : vector<2x16x32xf32> to vector<32x32xf32>
    %7 = arith.truncf %6 : vector<32x32xf32> to vector<32x32xbf16>
    %c0_2 = arith.constant 0 : index
    %c0_3 = arith.constant 0 : index
    %8 = vector.load %arg7[%c0_2, %c0_3] : memref<32x32xbf16, #tpu.memory_space<vmem>>, vector<32x32xbf16>
    %cst = arith.constant dense<0.000000e+00> : vector<32x32xf32>
    %9 = tpu.matmul %7, %8, %cst {dimension_numbers = #tpu.dot_dimension_numbers<[1], [0], [0], [1], [0, 0, 1, 1], [], []>} : vector<32x32xbf16>, vector<32x32xbf16>, vector<32x32xf32> -> vector<32x32xf32>
    %c0_4 = arith.constant 0 : index
    %c0_5 = arith.constant 0 : index
    %10 = vector.load %arg8[%c0_4, %c0_5] : memref<1x32xf32, #tpu.memory_space<vmem>>, vector<1x32xf32>
    %c0_6 = arith.constant 0 : index
    %c0_7 = arith.constant 0 : index
    %11 = vector.load %arg9[%c0_6, %c0_7] : memref<1x32xf32, #tpu.memory_space<vmem>>, vector<1x32xf32>
    %cst_8 = arith.constant dense<0.000000e+00> : vector<32xf32>
    %12 = vector.multi_reduction <add>, %9, %cst_8 [0] : vector<32x32xf32> to vector<32xf32>
    %13 = vector.shape_cast %12 : vector<32xf32> to vector<1x32xf32>
    %14 = arith.mulf %9, %9 : vector<32x32xf32>
    %cst_9 = arith.constant dense<0.000000e+00> : vector<32xf32>
    %15 = vector.multi_reduction <add>, %14, %cst_9 [0] : vector<32x32xf32> to vector<32xf32>
    %16 = vector.shape_cast %15 : vector<32xf32> to vector<1x32xf32>
    %cst_10 = arith.constant 3.125000e-02 : f32
    %17 = vector.broadcast %cst_10 : f32 to vector<1x32xf32>
    %18 = arith.mulf %13, %17 : vector<1x32xf32>
    %cst_11 = arith.constant 3.125000e-02 : f32
    %19 = vector.broadcast %cst_11 : f32 to vector<1x32xf32>
    %20 = arith.mulf %16, %19 : vector<1x32xf32>
    %21 = arith.mulf %18, %18 : vector<1x32xf32>
    %22 = arith.subf %20, %21 : vector<1x32xf32>
    %cst_12 = arith.constant 9.99999974E-6 : f32
    %23 = vector.broadcast %cst_12 : f32 to vector<1x32xf32>
    %24 = arith.addf %22, %23 : vector<1x32xf32>
    %25 = math.rsqrt %24 : vector<1x32xf32>
    %26 = arith.mulf %10, %25 : vector<1x32xf32>
    %27 = vector.broadcast %26 : vector<1x32xf32> to vector<32x32xf32>
    %28 = arith.mulf %9, %27 : vector<32x32xf32>
    %29 = arith.mulf %18, %26 : vector<1x32xf32>
    %30 = arith.subf %11, %29 : vector<1x32xf32>
    %31 = vector.broadcast %30 : vector<1x32xf32> to vector<32x32xf32>
    %32 = arith.addf %28, %31 : vector<32x32xf32>
    %c0_13 = arith.constant 0 : index
    %c0_14 = arith.constant 0 : index
    %c0_15 = arith.constant 0 : index
    %33 = vector.load %arg1[%c0_13, %c0_14, %c0_15] : memref<3x96x32xbf16, #tpu.memory_space<vmem>>, vector<1x96x32xbf16>
    %34 = vector.shape_cast %33 : vector<1x96x32xbf16> to vector<96x32xbf16>
    %c0_16 = arith.constant 0 : index
    %c0_17 = arith.constant 0 : index
    %c0_18 = arith.constant 0 : index
    %35 = vector.load %arg2[%c0_16, %c0_17, %c0_18] : memref<3x1x32xf32, #tpu.memory_space<vmem>>, vector<1x1x32xf32>
    %36 = vector.shape_cast %35 : vector<1x1x32xf32> to vector<1x32xf32>
    %c0_19 = arith.constant 0 : index
    %c0_20 = arith.constant 0 : index
    %c0_21 = arith.constant 0 : index
    %37 = vector.load %arg3[%c0_19, %c0_20, %c0_21] : memref<3x1x32xf32, #tpu.memory_space<vmem>>, vector<1x1x32xf32>
    %38 = vector.shape_cast %37 : vector<1x1x32xf32> to vector<1x32xf32>
    %c0_22 = arith.constant 0 : index
    %c0_23 = arith.constant 0 : index
    %c0_24 = arith.constant 0 : index
    %39 = vector.load %arg4[%c0_22, %c0_23, %c0_24] : memref<3x96x32xbf16, #tpu.memory_space<vmem>>, vector<1x96x32xbf16>
    %40 = vector.shape_cast %39 : vector<1x96x32xbf16> to vector<96x32xbf16>
    %c0_25 = arith.constant 0 : index
    %c0_26 = arith.constant 0 : index
    %c0_27 = arith.constant 0 : index
    %41 = vector.load %arg5[%c0_25, %c0_26, %c0_27] : memref<3x1x32xf32, #tpu.memory_space<vmem>>, vector<1x1x32xf32>
    %42 = vector.shape_cast %41 : vector<1x1x32xf32> to vector<1x32xf32>
    %c0_28 = arith.constant 0 : index
    %c0_29 = arith.constant 0 : index
    %c0_30 = arith.constant 0 : index
    %43 = vector.load %arg6[%c0_28, %c0_29, %c0_30] : memref<3x1x32xf32, #tpu.memory_space<vmem>>, vector<1x1x32xf32>
    %44 = vector.shape_cast %43 : vector<1x1x32xf32> to vector<1x32xf32>
    %45 = vector.shape_cast %6 : vector<32x32xf32> to vector<2x16x32xf32>
    %c1_i32 = arith.constant 1 : i32
    %46 = tpu.dynamic_rotate %45 by %c1_i32 dim 1 : vector<2x16x32xf32>, i32 -> vector<2x16x32xf32>
    %cst_31 = arith.constant 0.000000e+00 : f32
    %47 = vector.broadcast %cst_31 : f32 to vector<2x16x32xf32>
    %48 = arith.select %2, %46, %47 : vector<2x16x32xi1>, vector<2x16x32xf32>
    %c15_i32_32 = arith.constant 15 : i32
    %49 = tpu.dynamic_rotate %45 by %c15_i32_32 dim 1 : vector<2x16x32xf32>, i32 -> vector<2x16x32xf32>
    %cst_33 = arith.constant 0.000000e+00 : f32
    %50 = vector.broadcast %cst_33 : f32 to vector<2x16x32xf32>
    %51 = arith.select %4, %49, %50 : vector<2x16x32xi1>, vector<2x16x32xf32>
    %52 = tpu.concatenate %48, %45, %51 in 2 : vector<2x16x32xf32>, vector<2x16x32xf32>, vector<2x16x32xf32> -> vector<2x16x96xf32>
    %53 = arith.truncf %52 : vector<2x16x96xf32> to vector<2x16x96xbf16>
    %54 = vector.shape_cast %53 : vector<2x16x96xbf16> to vector<32x96xbf16>
    %cst_34 = arith.constant dense<0.000000e+00> : vector<32x32xf32>
    %55 = tpu.matmul %54, %34, %cst_34 {dimension_numbers = #tpu.dot_dimension_numbers<[1], [0], [0], [1], [0, 0, 1, 1], [], []>} : vector<32x96xbf16>, vector<96x32xbf16>, vector<32x32xf32> -> vector<32x32xf32>
    %cst_35 = arith.constant dense<0.000000e+00> : vector<32xf32>
    %56 = vector.multi_reduction <add>, %55, %cst_35 [0] : vector<32x32xf32> to vector<32xf32>
    %57 = vector.shape_cast %56 : vector<32xf32> to vector<1x32xf32>
    %58 = arith.mulf %55, %55 : vector<32x32xf32>
    %cst_36 = arith.constant dense<0.000000e+00> : vector<32xf32>
    %59 = vector.multi_reduction <add>, %58, %cst_36 [0] : vector<32x32xf32> to vector<32xf32>
    %60 = vector.shape_cast %59 : vector<32xf32> to vector<1x32xf32>
    %cst_37 = arith.constant 3.125000e-02 : f32
    %61 = vector.broadcast %cst_37 : f32 to vector<1x32xf32>
    %62 = arith.mulf %57, %61 : vector<1x32xf32>
    %cst_38 = arith.constant 3.125000e-02 : f32
    %63 = vector.broadcast %cst_38 : f32 to vector<1x32xf32>
    %64 = arith.mulf %60, %63 : vector<1x32xf32>
    %65 = arith.mulf %62, %62 : vector<1x32xf32>
    %66 = arith.subf %64, %65 : vector<1x32xf32>
    %cst_39 = arith.constant 9.99999974E-6 : f32
    %67 = vector.broadcast %cst_39 : f32 to vector<1x32xf32>
    %68 = arith.addf %66, %67 : vector<1x32xf32>
    %69 = math.rsqrt %68 : vector<1x32xf32>
    %70 = arith.mulf %36, %69 : vector<1x32xf32>
    %71 = vector.broadcast %70 : vector<1x32xf32> to vector<32x32xf32>
    %72 = arith.mulf %55, %71 : vector<32x32xf32>
    %73 = arith.mulf %62, %70 : vector<1x32xf32>
    %74 = arith.subf %38, %73 : vector<1x32xf32>
    %75 = vector.broadcast %74 : vector<1x32xf32> to vector<32x32xf32>
    %76 = arith.addf %72, %75 : vector<32x32xf32>
    %cst_40 = arith.constant 0.000000e+00 : f32
    %77 = vector.broadcast %cst_40 : f32 to vector<32x32xf32>
    %78 = arith.maximumf %76, %77 : vector<32x32xf32>
    %79 = vector.shape_cast %78 : vector<32x32xf32> to vector<2x16x32xf32>
    %c1_i32_41 = arith.constant 1 : i32
    %80 = tpu.dynamic_rotate %79 by %c1_i32_41 dim 1 : vector<2x16x32xf32>, i32 -> vector<2x16x32xf32>
    %cst_42 = arith.constant 0.000000e+00 : f32
    %81 = vector.broadcast %cst_42 : f32 to vector<2x16x32xf32>
    %82 = arith.select %2, %80, %81 : vector<2x16x32xi1>, vector<2x16x32xf32>
    %c15_i32_43 = arith.constant 15 : i32
    %83 = tpu.dynamic_rotate %79 by %c15_i32_43 dim 1 : vector<2x16x32xf32>, i32 -> vector<2x16x32xf32>
    %cst_44 = arith.constant 0.000000e+00 : f32
    %84 = vector.broadcast %cst_44 : f32 to vector<2x16x32xf32>
    %85 = arith.select %4, %83, %84 : vector<2x16x32xi1>, vector<2x16x32xf32>
    %86 = tpu.concatenate %82, %79, %85 in 2 : vector<2x16x32xf32>, vector<2x16x32xf32>, vector<2x16x32xf32> -> vector<2x16x96xf32>
    %87 = arith.truncf %86 : vector<2x16x96xf32> to vector<2x16x96xbf16>
    %88 = vector.shape_cast %87 : vector<2x16x96xbf16> to vector<32x96xbf16>
    %cst_45 = arith.constant dense<0.000000e+00> : vector<32x32xf32>
    %89 = tpu.matmul %88, %40, %cst_45 {dimension_numbers = #tpu.dot_dimension_numbers<[1], [0], [0], [1], [0, 0, 1, 1], [], []>} : vector<32x96xbf16>, vector<96x32xbf16>, vector<32x32xf32> -> vector<32x32xf32>
    %cst_46 = arith.constant dense<0.000000e+00> : vector<32xf32>
    %90 = vector.multi_reduction <add>, %89, %cst_46 [0] : vector<32x32xf32> to vector<32xf32>
    %91 = vector.shape_cast %90 : vector<32xf32> to vector<1x32xf32>
    %92 = arith.mulf %89, %89 : vector<32x32xf32>
    %cst_47 = arith.constant dense<0.000000e+00> : vector<32xf32>
    %93 = vector.multi_reduction <add>, %92, %cst_47 [0] : vector<32x32xf32> to vector<32xf32>
    %94 = vector.shape_cast %93 : vector<32xf32> to vector<1x32xf32>
    %cst_48 = arith.constant 3.125000e-02 : f32
    %95 = vector.broadcast %cst_48 : f32 to vector<1x32xf32>
    %96 = arith.mulf %91, %95 : vector<1x32xf32>
    %cst_49 = arith.constant 3.125000e-02 : f32
    %97 = vector.broadcast %cst_49 : f32 to vector<1x32xf32>
    %98 = arith.mulf %94, %97 : vector<1x32xf32>
    %99 = arith.mulf %96, %96 : vector<1x32xf32>
    %100 = arith.subf %98, %99 : vector<1x32xf32>
    %cst_50 = arith.constant 9.99999974E-6 : f32
    %101 = vector.broadcast %cst_50 : f32 to vector<1x32xf32>
    %102 = arith.addf %100, %101 : vector<1x32xf32>
    %103 = math.rsqrt %102 : vector<1x32xf32>
    %104 = arith.mulf %42, %103 : vector<1x32xf32>
    %105 = vector.broadcast %104 : vector<1x32xf32> to vector<32x32xf32>
    %106 = arith.mulf %89, %105 : vector<32x32xf32>
    %107 = arith.mulf %96, %104 : vector<1x32xf32>
    %108 = arith.subf %44, %107 : vector<1x32xf32>
    %109 = vector.broadcast %108 : vector<1x32xf32> to vector<32x32xf32>
    %110 = arith.addf %106, %109 : vector<32x32xf32>
    %111 = arith.addf %110, %32 : vector<32x32xf32>
    %cst_51 = arith.constant 0.000000e+00 : f32
    %112 = vector.broadcast %cst_51 : f32 to vector<32x32xf32>
    %113 = arith.maximumf %111, %112 : vector<32x32xf32>
    %c1 = arith.constant 1 : index
    %c0_52 = arith.constant 0 : index
    %c0_53 = arith.constant 0 : index
    %114 = vector.load %arg1[%c1, %c0_52, %c0_53] : memref<3x96x32xbf16, #tpu.memory_space<vmem>>, vector<1x96x32xbf16>
    %115 = vector.shape_cast %114 : vector<1x96x32xbf16> to vector<96x32xbf16>
    %c1_54 = arith.constant 1 : index
    %c0_55 = arith.constant 0 : index
    %c0_56 = arith.constant 0 : index
    %116 = vector.load %arg2[%c1_54, %c0_55, %c0_56] : memref<3x1x32xf32, #tpu.memory_space<vmem>>, vector<1x1x32xf32>
    %117 = vector.shape_cast %116 : vector<1x1x32xf32> to vector<1x32xf32>
    %c1_57 = arith.constant 1 : index
    %c0_58 = arith.constant 0 : index
    %c0_59 = arith.constant 0 : index
    %118 = vector.load %arg3[%c1_57, %c0_58, %c0_59] : memref<3x1x32xf32, #tpu.memory_space<vmem>>, vector<1x1x32xf32>
    %119 = vector.shape_cast %118 : vector<1x1x32xf32> to vector<1x32xf32>
    %c1_60 = arith.constant 1 : index
    %c0_61 = arith.constant 0 : index
    %c0_62 = arith.constant 0 : index
    %120 = vector.load %arg4[%c1_60, %c0_61, %c0_62] : memref<3x96x32xbf16, #tpu.memory_space<vmem>>, vector<1x96x32xbf16>
    %121 = vector.shape_cast %120 : vector<1x96x32xbf16> to vector<96x32xbf16>
    %c1_63 = arith.constant 1 : index
    %c0_64 = arith.constant 0 : index
    %c0_65 = arith.constant 0 : index
    %122 = vector.load %arg5[%c1_63, %c0_64, %c0_65] : memref<3x1x32xf32, #tpu.memory_space<vmem>>, vector<1x1x32xf32>
    %123 = vector.shape_cast %122 : vector<1x1x32xf32> to vector<1x32xf32>
    %c1_66 = arith.constant 1 : index
    %c0_67 = arith.constant 0 : index
    %c0_68 = arith.constant 0 : index
    %124 = vector.load %arg6[%c1_66, %c0_67, %c0_68] : memref<3x1x32xf32, #tpu.memory_space<vmem>>, vector<1x1x32xf32>
    %125 = vector.shape_cast %124 : vector<1x1x32xf32> to vector<1x32xf32>
    %126 = vector.shape_cast %113 : vector<32x32xf32> to vector<2x16x32xf32>
    %c1_i32_69 = arith.constant 1 : i32
    %127 = tpu.dynamic_rotate %126 by %c1_i32_69 dim 1 : vector<2x16x32xf32>, i32 -> vector<2x16x32xf32>
    %cst_70 = arith.constant 0.000000e+00 : f32
    %128 = vector.broadcast %cst_70 : f32 to vector<2x16x32xf32>
    %129 = arith.select %2, %127, %128 : vector<2x16x32xi1>, vector<2x16x32xf32>
    %c15_i32_71 = arith.constant 15 : i32
    %130 = tpu.dynamic_rotate %126 by %c15_i32_71 dim 1 : vector<2x16x32xf32>, i32 -> vector<2x16x32xf32>
    %cst_72 = arith.constant 0.000000e+00 : f32
    %131 = vector.broadcast %cst_72 : f32 to vector<2x16x32xf32>
    %132 = arith.select %4, %130, %131 : vector<2x16x32xi1>, vector<2x16x32xf32>
    %133 = tpu.concatenate %129, %126, %132 in 2 : vector<2x16x32xf32>, vector<2x16x32xf32>, vector<2x16x32xf32> -> vector<2x16x96xf32>
    %134 = arith.truncf %133 : vector<2x16x96xf32> to vector<2x16x96xbf16>
    %135 = vector.shape_cast %134 : vector<2x16x96xbf16> to vector<32x96xbf16>
    %cst_73 = arith.constant dense<0.000000e+00> : vector<32x32xf32>
    %136 = tpu.matmul %135, %115, %cst_73 {dimension_numbers = #tpu.dot_dimension_numbers<[1], [0], [0], [1], [0, 0, 1, 1], [], []>} : vector<32x96xbf16>, vector<96x32xbf16>, vector<32x32xf32> -> vector<32x32xf32>
    %cst_74 = arith.constant dense<0.000000e+00> : vector<32xf32>
    %137 = vector.multi_reduction <add>, %136, %cst_74 [0] : vector<32x32xf32> to vector<32xf32>
    %138 = vector.shape_cast %137 : vector<32xf32> to vector<1x32xf32>
    %139 = arith.mulf %136, %136 : vector<32x32xf32>
    %cst_75 = arith.constant dense<0.000000e+00> : vector<32xf32>
    %140 = vector.multi_reduction <add>, %139, %cst_75 [0] : vector<32x32xf32> to vector<32xf32>
    %141 = vector.shape_cast %140 : vector<32xf32> to vector<1x32xf32>
    %cst_76 = arith.constant 3.125000e-02 : f32
    %142 = vector.broadcast %cst_76 : f32 to vector<1x32xf32>
    %143 = arith.mulf %138, %142 : vector<1x32xf32>
    %cst_77 = arith.constant 3.125000e-02 : f32
    %144 = vector.broadcast %cst_77 : f32 to vector<1x32xf32>
    %145 = arith.mulf %141, %144 : vector<1x32xf32>
    %146 = arith.mulf %143, %143 : vector<1x32xf32>
    %147 = arith.subf %145, %146 : vector<1x32xf32>
    %cst_78 = arith.constant 9.99999974E-6 : f32
    %148 = vector.broadcast %cst_78 : f32 to vector<1x32xf32>
    %149 = arith.addf %147, %148 : vector<1x32xf32>
    %150 = math.rsqrt %149 : vector<1x32xf32>
    %151 = arith.mulf %117, %150 : vector<1x32xf32>
    %152 = vector.broadcast %151 : vector<1x32xf32> to vector<32x32xf32>
    %153 = arith.mulf %136, %152 : vector<32x32xf32>
    %154 = arith.mulf %143, %151 : vector<1x32xf32>
    %155 = arith.subf %119, %154 : vector<1x32xf32>
    %156 = vector.broadcast %155 : vector<1x32xf32> to vector<32x32xf32>
    %157 = arith.addf %153, %156 : vector<32x32xf32>
    %cst_79 = arith.constant 0.000000e+00 : f32
    %158 = vector.broadcast %cst_79 : f32 to vector<32x32xf32>
    %159 = arith.maximumf %157, %158 : vector<32x32xf32>
    %160 = vector.shape_cast %159 : vector<32x32xf32> to vector<2x16x32xf32>
    %c1_i32_80 = arith.constant 1 : i32
    %161 = tpu.dynamic_rotate %160 by %c1_i32_80 dim 1 : vector<2x16x32xf32>, i32 -> vector<2x16x32xf32>
    %cst_81 = arith.constant 0.000000e+00 : f32
    %162 = vector.broadcast %cst_81 : f32 to vector<2x16x32xf32>
    %163 = arith.select %2, %161, %162 : vector<2x16x32xi1>, vector<2x16x32xf32>
    %c15_i32_82 = arith.constant 15 : i32
    %164 = tpu.dynamic_rotate %160 by %c15_i32_82 dim 1 : vector<2x16x32xf32>, i32 -> vector<2x16x32xf32>
    %cst_83 = arith.constant 0.000000e+00 : f32
    %165 = vector.broadcast %cst_83 : f32 to vector<2x16x32xf32>
    %166 = arith.select %4, %164, %165 : vector<2x16x32xi1>, vector<2x16x32xf32>
    %167 = tpu.concatenate %163, %160, %166 in 2 : vector<2x16x32xf32>, vector<2x16x32xf32>, vector<2x16x32xf32> -> vector<2x16x96xf32>
    %168 = arith.truncf %167 : vector<2x16x96xf32> to vector<2x16x96xbf16>
    %169 = vector.shape_cast %168 : vector<2x16x96xbf16> to vector<32x96xbf16>
    %cst_84 = arith.constant dense<0.000000e+00> : vector<32x32xf32>
    %170 = tpu.matmul %169, %121, %cst_84 {dimension_numbers = #tpu.dot_dimension_numbers<[1], [0], [0], [1], [0, 0, 1, 1], [], []>} : vector<32x96xbf16>, vector<96x32xbf16>, vector<32x32xf32> -> vector<32x32xf32>
    %cst_85 = arith.constant dense<0.000000e+00> : vector<32xf32>
    %171 = vector.multi_reduction <add>, %170, %cst_85 [0] : vector<32x32xf32> to vector<32xf32>
    %172 = vector.shape_cast %171 : vector<32xf32> to vector<1x32xf32>
    %173 = arith.mulf %170, %170 : vector<32x32xf32>
    %cst_86 = arith.constant dense<0.000000e+00> : vector<32xf32>
    %174 = vector.multi_reduction <add>, %173, %cst_86 [0] : vector<32x32xf32> to vector<32xf32>
    %175 = vector.shape_cast %174 : vector<32xf32> to vector<1x32xf32>
    %cst_87 = arith.constant 3.125000e-02 : f32
    %176 = vector.broadcast %cst_87 : f32 to vector<1x32xf32>
    %177 = arith.mulf %172, %176 : vector<1x32xf32>
    %cst_88 = arith.constant 3.125000e-02 : f32
    %178 = vector.broadcast %cst_88 : f32 to vector<1x32xf32>
    %179 = arith.mulf %175, %178 : vector<1x32xf32>
    %180 = arith.mulf %177, %177 : vector<1x32xf32>
    %181 = arith.subf %179, %180 : vector<1x32xf32>
    %cst_89 = arith.constant 9.99999974E-6 : f32
    %182 = vector.broadcast %cst_89 : f32 to vector<1x32xf32>
    %183 = arith.addf %181, %182 : vector<1x32xf32>
    %184 = math.rsqrt %183 : vector<1x32xf32>
    %185 = arith.mulf %123, %184 : vector<1x32xf32>
    %186 = vector.broadcast %185 : vector<1x32xf32> to vector<32x32xf32>
    %187 = arith.mulf %170, %186 : vector<32x32xf32>
    %188 = arith.mulf %177, %185 : vector<1x32xf32>
    %189 = arith.subf %125, %188 : vector<1x32xf32>
    %190 = vector.broadcast %189 : vector<1x32xf32> to vector<32x32xf32>
    %191 = arith.addf %187, %190 : vector<32x32xf32>
    %192 = arith.addf %191, %113 : vector<32x32xf32>
    %cst_90 = arith.constant 0.000000e+00 : f32
    %193 = vector.broadcast %cst_90 : f32 to vector<32x32xf32>
    %194 = arith.maximumf %192, %193 : vector<32x32xf32>
    %c2 = arith.constant 2 : index
    %c0_91 = arith.constant 0 : index
    %c0_92 = arith.constant 0 : index
    %195 = vector.load %arg1[%c2, %c0_91, %c0_92] : memref<3x96x32xbf16, #tpu.memory_space<vmem>>, vector<1x96x32xbf16>
    %196 = vector.shape_cast %195 : vector<1x96x32xbf16> to vector<96x32xbf16>
    %c2_93 = arith.constant 2 : index
    %c0_94 = arith.constant 0 : index
    %c0_95 = arith.constant 0 : index
    %197 = vector.load %arg2[%c2_93, %c0_94, %c0_95] : memref<3x1x32xf32, #tpu.memory_space<vmem>>, vector<1x1x32xf32>
    %198 = vector.shape_cast %197 : vector<1x1x32xf32> to vector<1x32xf32>
    %c2_96 = arith.constant 2 : index
    %c0_97 = arith.constant 0 : index
    %c0_98 = arith.constant 0 : index
    %199 = vector.load %arg3[%c2_96, %c0_97, %c0_98] : memref<3x1x32xf32, #tpu.memory_space<vmem>>, vector<1x1x32xf32>
    %200 = vector.shape_cast %199 : vector<1x1x32xf32> to vector<1x32xf32>
    %c2_99 = arith.constant 2 : index
    %c0_100 = arith.constant 0 : index
    %c0_101 = arith.constant 0 : index
    %201 = vector.load %arg4[%c2_99, %c0_100, %c0_101] : memref<3x96x32xbf16, #tpu.memory_space<vmem>>, vector<1x96x32xbf16>
    %202 = vector.shape_cast %201 : vector<1x96x32xbf16> to vector<96x32xbf16>
    %c2_102 = arith.constant 2 : index
    %c0_103 = arith.constant 0 : index
    %c0_104 = arith.constant 0 : index
    %203 = vector.load %arg5[%c2_102, %c0_103, %c0_104] : memref<3x1x32xf32, #tpu.memory_space<vmem>>, vector<1x1x32xf32>
    %204 = vector.shape_cast %203 : vector<1x1x32xf32> to vector<1x32xf32>
    %c2_105 = arith.constant 2 : index
    %c0_106 = arith.constant 0 : index
    %c0_107 = arith.constant 0 : index
    %205 = vector.load %arg6[%c2_105, %c0_106, %c0_107] : memref<3x1x32xf32, #tpu.memory_space<vmem>>, vector<1x1x32xf32>
    %206 = vector.shape_cast %205 : vector<1x1x32xf32> to vector<1x32xf32>
    %207 = vector.shape_cast %194 : vector<32x32xf32> to vector<2x16x32xf32>
    %c1_i32_108 = arith.constant 1 : i32
    %208 = tpu.dynamic_rotate %207 by %c1_i32_108 dim 1 : vector<2x16x32xf32>, i32 -> vector<2x16x32xf32>
    %cst_109 = arith.constant 0.000000e+00 : f32
    %209 = vector.broadcast %cst_109 : f32 to vector<2x16x32xf32>
    %210 = arith.select %2, %208, %209 : vector<2x16x32xi1>, vector<2x16x32xf32>
    %c15_i32_110 = arith.constant 15 : i32
    %211 = tpu.dynamic_rotate %207 by %c15_i32_110 dim 1 : vector<2x16x32xf32>, i32 -> vector<2x16x32xf32>
    %cst_111 = arith.constant 0.000000e+00 : f32
    %212 = vector.broadcast %cst_111 : f32 to vector<2x16x32xf32>
    %213 = arith.select %4, %211, %212 : vector<2x16x32xi1>, vector<2x16x32xf32>
    %214 = tpu.concatenate %210, %207, %213 in 2 : vector<2x16x32xf32>, vector<2x16x32xf32>, vector<2x16x32xf32> -> vector<2x16x96xf32>
    %215 = arith.truncf %214 : vector<2x16x96xf32> to vector<2x16x96xbf16>
    %216 = vector.shape_cast %215 : vector<2x16x96xbf16> to vector<32x96xbf16>
    %cst_112 = arith.constant dense<0.000000e+00> : vector<32x32xf32>
    %217 = tpu.matmul %216, %196, %cst_112 {dimension_numbers = #tpu.dot_dimension_numbers<[1], [0], [0], [1], [0, 0, 1, 1], [], []>} : vector<32x96xbf16>, vector<96x32xbf16>, vector<32x32xf32> -> vector<32x32xf32>
    %cst_113 = arith.constant dense<0.000000e+00> : vector<32xf32>
    %218 = vector.multi_reduction <add>, %217, %cst_113 [0] : vector<32x32xf32> to vector<32xf32>
    %219 = vector.shape_cast %218 : vector<32xf32> to vector<1x32xf32>
    %220 = arith.mulf %217, %217 : vector<32x32xf32>
    %cst_114 = arith.constant dense<0.000000e+00> : vector<32xf32>
    %221 = vector.multi_reduction <add>, %220, %cst_114 [0] : vector<32x32xf32> to vector<32xf32>
    %222 = vector.shape_cast %221 : vector<32xf32> to vector<1x32xf32>
    %cst_115 = arith.constant 3.125000e-02 : f32
    %223 = vector.broadcast %cst_115 : f32 to vector<1x32xf32>
    %224 = arith.mulf %219, %223 : vector<1x32xf32>
    %cst_116 = arith.constant 3.125000e-02 : f32
    %225 = vector.broadcast %cst_116 : f32 to vector<1x32xf32>
    %226 = arith.mulf %222, %225 : vector<1x32xf32>
    %227 = arith.mulf %224, %224 : vector<1x32xf32>
    %228 = arith.subf %226, %227 : vector<1x32xf32>
    %cst_117 = arith.constant 9.99999974E-6 : f32
    %229 = vector.broadcast %cst_117 : f32 to vector<1x32xf32>
    %230 = arith.addf %228, %229 : vector<1x32xf32>
    %231 = math.rsqrt %230 : vector<1x32xf32>
    %232 = arith.mulf %198, %231 : vector<1x32xf32>
    %233 = vector.broadcast %232 : vector<1x32xf32> to vector<32x32xf32>
    %234 = arith.mulf %217, %233 : vector<32x32xf32>
    %235 = arith.mulf %224, %232 : vector<1x32xf32>
    %236 = arith.subf %200, %235 : vector<1x32xf32>
    %237 = vector.broadcast %236 : vector<1x32xf32> to vector<32x32xf32>
    %238 = arith.addf %234, %237 : vector<32x32xf32>
    %cst_118 = arith.constant 0.000000e+00 : f32
    %239 = vector.broadcast %cst_118 : f32 to vector<32x32xf32>
    %240 = arith.maximumf %238, %239 : vector<32x32xf32>
    %241 = vector.shape_cast %240 : vector<32x32xf32> to vector<2x16x32xf32>
    %c1_i32_119 = arith.constant 1 : i32
    %242 = tpu.dynamic_rotate %241 by %c1_i32_119 dim 1 : vector<2x16x32xf32>, i32 -> vector<2x16x32xf32>
    %cst_120 = arith.constant 0.000000e+00 : f32
    %243 = vector.broadcast %cst_120 : f32 to vector<2x16x32xf32>
    %244 = arith.select %2, %242, %243 : vector<2x16x32xi1>, vector<2x16x32xf32>
    %c15_i32_121 = arith.constant 15 : i32
    %245 = tpu.dynamic_rotate %241 by %c15_i32_121 dim 1 : vector<2x16x32xf32>, i32 -> vector<2x16x32xf32>
    %cst_122 = arith.constant 0.000000e+00 : f32
    %246 = vector.broadcast %cst_122 : f32 to vector<2x16x32xf32>
    %247 = arith.select %4, %245, %246 : vector<2x16x32xi1>, vector<2x16x32xf32>
    %248 = tpu.concatenate %244, %241, %247 in 2 : vector<2x16x32xf32>, vector<2x16x32xf32>, vector<2x16x32xf32> -> vector<2x16x96xf32>
    %249 = arith.truncf %248 : vector<2x16x96xf32> to vector<2x16x96xbf16>
    %250 = vector.shape_cast %249 : vector<2x16x96xbf16> to vector<32x96xbf16>
    %cst_123 = arith.constant dense<0.000000e+00> : vector<32x32xf32>
    %251 = tpu.matmul %250, %202, %cst_123 {dimension_numbers = #tpu.dot_dimension_numbers<[1], [0], [0], [1], [0, 0, 1, 1], [], []>} : vector<32x96xbf16>, vector<96x32xbf16>, vector<32x32xf32> -> vector<32x32xf32>
    %cst_124 = arith.constant dense<0.000000e+00> : vector<32xf32>
    %252 = vector.multi_reduction <add>, %251, %cst_124 [0] : vector<32x32xf32> to vector<32xf32>
    %253 = vector.shape_cast %252 : vector<32xf32> to vector<1x32xf32>
    %254 = arith.mulf %251, %251 : vector<32x32xf32>
    %cst_125 = arith.constant dense<0.000000e+00> : vector<32xf32>
    %255 = vector.multi_reduction <add>, %254, %cst_125 [0] : vector<32x32xf32> to vector<32xf32>
    %256 = vector.shape_cast %255 : vector<32xf32> to vector<1x32xf32>
    %cst_126 = arith.constant 3.125000e-02 : f32
    %257 = vector.broadcast %cst_126 : f32 to vector<1x32xf32>
    %258 = arith.mulf %253, %257 : vector<1x32xf32>
    %cst_127 = arith.constant 3.125000e-02 : f32
    %259 = vector.broadcast %cst_127 : f32 to vector<1x32xf32>
    %260 = arith.mulf %256, %259 : vector<1x32xf32>
    %261 = arith.mulf %258, %258 : vector<1x32xf32>
    %262 = arith.subf %260, %261 : vector<1x32xf32>
    %cst_128 = arith.constant 9.99999974E-6 : f32
    %263 = vector.broadcast %cst_128 : f32 to vector<1x32xf32>
    %264 = arith.addf %262, %263 : vector<1x32xf32>
    %265 = math.rsqrt %264 : vector<1x32xf32>
    %266 = arith.mulf %204, %265 : vector<1x32xf32>
    %267 = vector.broadcast %266 : vector<1x32xf32> to vector<32x32xf32>
    %268 = arith.mulf %251, %267 : vector<32x32xf32>
    %269 = arith.mulf %258, %266 : vector<1x32xf32>
    %270 = arith.subf %206, %269 : vector<1x32xf32>
    %271 = vector.broadcast %270 : vector<1x32xf32> to vector<32x32xf32>
    %272 = arith.addf %268, %271 : vector<32x32xf32>
    %273 = arith.addf %272, %194 : vector<32x32xf32>
    %cst_129 = arith.constant 0.000000e+00 : f32
    %274 = vector.broadcast %cst_129 : f32 to vector<32x32xf32>
    %275 = arith.maximumf %273, %274 : vector<32x32xf32>
    %276 = vector.shape_cast %275 : vector<32x32xf32> to vector<2x16x32xf32>
    %c0_130 = arith.constant 0 : index
    %c0_131 = arith.constant 0 : index
    %c0_132 = arith.constant 0 : index
    %277 = vector.load %arg10[%c0_130, %c0_131, %c0_132] : memref<2x16x32xf32, #tpu.memory_space<vmem>>, vector<2x16x32xf32>
    tpu.vector_store %arg10[%c0_130, %c0_131, %c0_132], %276 {strides = array<i32>} : memref<2x16x32xf32, #tpu.memory_space<vmem>>, vector<2x16x32xf32>,
    return
  }
}

</mosaic_0001>

<bundles_post_ra>
// kernel: original_forward.1
= control target key start
LH: loop header
LB: loop body
LE: loop exit
PB: predicated region body
PF: predicated region fallthrough
CT: control target
= control target key end

     0   :  { %v37_v2 = vlaneseq  ;;  %s2100_s23 = smov 32   ;;  %s2101_s29 = smov 64   ;;  %s2764_s0 = inlined_call_operand.vmem [shape: f32[2,16,32], index: 0, kind: input, shape index: {}]   ;;  %s2765_s1 = inlined_call_operand.vmem [shape: bf16[3,96,32], index: 1, kind: input, shape index: {}]   ;;  %s2766_s2 = inlined_call_operand.vmem [shape: f32[3,1,32], index: 2, kind: input, shape index: {}]   ;;  %s2767_s3 = inlined_call_operand.vmem [shape: f32[3,1,32], index: 3, kind: input, shape index: {}]   ;;  %s2768_s4 = inlined_call_operand.vmem [shape: bf16[3,96,32], index: 4, kind: input, shape index: {}]   ;;  %s2769_s5 = inlined_call_operand.vmem [shape: f32[3,1,32], index: 5, kind: input, shape index: {}]   ;;  %s2770_s6 = inlined_call_operand.vmem [shape: f32[3,1,32], index: 6, kind: input, shape index: {}]   ;;  %s2771_s7 = inlined_call_operand.vmem [shape: bf16[32,32], index: 7, kind: input, shape index: {}]   ;;  %s2772_s8 = inlined_call_operand.vmem [shape: f32[1,32], index: 8, kind: input, shape index: {}]   ;;  %s2773_s9 = inlined_call_operand.vmem [shape: f32[1,32], index: 9, kind: input, shape index: {}]   ;;  %s2774_s10 = inlined_call_operand.hbm [shape: f32[2,16,32], index: 10, kind: output, shape index: {}]  }
   0x1   :  { %v2163_v0 = vld [vmem:[%s2764_s0] sm:$0xff]  ;;  %v2168_v1 = vld [vmem:[%s2764_s0 + $0x8] sm:$0xff]  ;;  %v2173_v3 = vld [vmem:[%s2764_s0 + $0x10] sm:$0xff] }
   0x2   :  { %v1904_v4 = vpack.i.bf16 %v2168_v1, %v2163_v0  ;;  %v224_v5 = vrot.slane %v2163_v0, 1  ;;  %v2181_v6 = vld [vmem:[%s2764_s0 + $0x18] sm:$0xff]  ;;  %v2183_v7 = vshrl.u32 %v37_v2, 7  ;;  %v226_v8 = vrot.slane %v2168_v1, 1  ;;  %v2024_v9 = vld [vmem:[%s2765_s1] sm:$0xff]   ;;  %v2025_v13 = vld [vmem:[%s2765_s1 + $0x8] sm:$0xff]  }
   0x3   :  { %v1909_v10 = vpack.i.bf16 %v2181_v6, %v2173_v3  ;;  %v225_v11 = vrot.slane %v2173_v3, 1  ;;  %v227_v12 = vrot.slane %v2181_v6, 1  ;;  %1803 = vmatprep.subr.bf16.mxu1 %v2024_v9  ;;  %v2026_v18 = vld [vmem:[%s2765_s1 + $0x10] sm:$0xff]   ;;  %v2027_v23 = vld [vmem:[%s2765_s1 + $0x18] sm:$0xff]   ;;  %v2028_v25 = vld [vmem:[%s2765_s1 + $0x20] sm:$0xff]  }
   0x4   :  { %1905 = vrot.lane.b32.xlu0 %v1904_v4, %s2100_s23  ;;  %v2198_v14 = vadd.s32 8, %v2183_v7  ;;  %vm228_vm0 = vcmp.lt.s32.totalorder %v2183_v7, 7  ;;  %1804 = vmatpush3.bf16.msra.mxu1 %v2024_v9  ;;  %v2029_v26 = vld [vmem:[%s2765_s1 + $0x28] sm:$0xff]  }
   0x5   :  { %v229_v15 = vsel %vm228_vm0, %v224_v5, %v226_v8  ;;  %v231_v16 = vsel %vm228_vm0, %v226_v8, %v224_v5  ;;  %v232_v17 = vsel %vm228_vm0, %v227_v12, %v225_v11  ;;  %1805 = vmatprep.subr.bf16.mxu1 %v2025_v13  ;;  %v230_v20 = vsel %vm228_vm0, %v225_v11, %v227_v12 }
   0x6   :  { %vm43_vm1 = vcmp.lt.s32.totalorder %v2198_v14, 15 }
   0x7   :  { %v234_v19 = vsel %vm43_vm1, %v231_v16, 0.0  ;;  %v236_v21 = vsel %vm43_vm1, %v232_v17, 0.0 }
   0x8   :  { %1910 = vrot.lane.b32.xlu0 %v1909_v10, %s2100_s23  ;;  %v1914_v22 = vpack.i.bf16 %v234_v19, %v229_v15  ;;  %1806 = vmatpush3.bf16.msra.mxu1 %v2025_v13  ;;  %v1919_v24 = vpack.i.bf16 %v236_v21, %v230_v20 }
   0x9   :  { %1807 = vmatprep.subr.bf16.mxu1 %v2026_v18 }
   0xa   :  { %1915 = vrot.lane.b32.xlu1 %v1914_v22, %s2101_s29 }
   0xc   :  { %1808 = vmatpush3.bf16.msra.mxu1 %v2026_v18 }
   0xd   :  { %1809 = vmatprep.subr.bf16.mxu1 %v2027_v23 }
   0xe   :  { %1920 = vrot.lane.b32.xlu1 %v1919_v24, %s2101_s29 }
  0x10   :  { %1810 = vmatpush3.bf16.msra.mxu1 %v2027_v23 }
  0x11   :  { %1811 = vmatprep.subr.bf16.mxu1 %v2028_v25 }
  0x14   :  { %1812 = vmatpush3.bf16.msra.mxu1 %v2028_v25 }
  0x15   :  { %1813 = vmatprep.subr.bf16.mxu1 %v2029_v26 }
  0x18   :  { %1814 = vmatpush3.bf16.msra.mxu1 %v2029_v26 }
  0x19   :  { %15 = vsyncpa [#allocation3], 0  ;;  %v213_v27 = vrot.slane %v2168_v1, 7  ;;  %v211_v28 = vrot.slane %v2163_v0, 7  ;;  %vm215_vm2 = vcmp.lt.s32.totalorder %v2183_v7, 1  ;;  %v214_v30 = vrot.slane %v2181_v6, 7 }
  0x1a   :  { %v212_v31 = vrot.slane %v2173_v3, 7  ;;  %vm40_vm3 = vcmp.gt.s32.totalorder %v2183_v7, 0  ;;  %vm66_vm4 = vcmask 261120   ;;  %vm273_vm5 = vcmask 523264   ;;  %v2030_v59 = vld [vmem:[%s2771_s7] sm:$0xff]   ;;  %v2031_v60 = vld [vmem:[%s2771_s7 + $0x8] sm:$0xff]  }
  0x1b   :  { %v218_v32 = vsel %vm215_vm2, %v213_v27, %v211_v28  ;;  %v216_v36 = vsel %vm215_vm2, %v211_v28, %v213_v27  ;;  %vm316_vm6 = vcmask 785408   ;;  %v48_v61 = vpack.c.bf16 %v2168_v1, %v2163_v0  ;;  %1795 = vmatprep.subr.bf16.mxu0 %v2030_v59  ;;  %v2032_v62 = vld [vmem:[%s2768_s4] sm:$0xff]   ;;  %v2033_v2 = vld [vmem:[%s2768_s4 + $0x8] sm:$0xff]   ;;  %v2034_v0 = vld [vmem:[%s2768_s4 + $0x10] sm:$0xff]  }
  0x1c   :  { %v220_v37 = vsel %vm40_vm3, %v218_v32, 0.0  ;;  %v219_v38 = vsel %vm215_vm2, %v214_v30, %v212_v31  ;;  %v217_v46 = vsel %vm215_vm2, %v212_v31, %v214_v30  ;;  %1796 = vmatpush3.bf16.msra.mxu0 %v2030_v59  ;;  %v49_v63 = vpack.c.bf16 %v2181_v6, %v2173_v3  ;;  %v2035_v1 = vld [vmem:[%s2768_s4 + $0x18] sm:$0xff]  }
  0x1d   :  { %v222_v47 = vsel %vm40_vm3, %v219_v38, 0.0  ;;  %1799 = vmatprep.mubr.msk.bf16.mxu0 %vm66_vm4, %v48_v61  ;;  %1797 = vmatprep.subr.bf16.mxu0 %v2031_v60 }
  0x20   :  { %1798 = vmatpush3.bf16.msra.mxu0 %v2031_v60 }
  0x21   :  { %1819 = vmatprep.subr.bf16.mxu0 %v2032_v62 }
  0x23   :  { %1800 = vmatmul.mubr.msk.bf16.vlgmr.msra.gmra.mrb[0].mxu0 %vm66_vm4, %v49_v63 }
  0x24   :  { %1820 = vmatpush3.bf16.msra.mxu0 %v2032_v62  ;;  %v2037_v62 = vld [vmem:[%s2768_s4 + $0x28] sm:$0xff]  }
  0x25   :  { %1821 = vmatprep.subr.bf16.mxu0 %v2033_v2 }
  0x28   :  { %1822 = vmatpush3.bf16.msra.mxu0 %v2033_v2 }
  0x29   :  { %1823 = vmatprep.subr.bf16.mxu0 %v2034_v0 }
  0x2c   :  { %1824 = vmatpush3.bf16.msra.mxu0 %v2034_v0 }
  0x2d   :  { %1825 = vmatprep.subr.bf16.mxu0 %v2035_v1 }
  0x30   :  { %1826 = vmatpush3.bf16.msra.mxu0 %v2035_v1 }
  0x76   :  { %v1906_v29 = vpop.permute.xlu0 %1905 }
  0x77   :  { %v1908_v33 = vunpack.i.h.bf16 %v1906_v29  ;;  %v1907_v34 = vunpack.i.l.bf16 %v1906_v29 }
  0x79   :  { %v269_v42 = vsel %vm66_vm4, %v220_v37, %v1907_v34  ;;  %v270_v43 = vsel %vm66_vm4, %v216_v36, %v1908_v33 }
  0x7a   :  { %v1911_v35 = vpop.permute.xlu0 %1910 }
  0x7b   :  { %v1913_v40 = vunpack.i.h.bf16 %v1911_v35  ;;  %v1912_v41 = vunpack.i.l.bf16 %v1911_v35 }
  0x7c   :  { %v1916_v39 = vpop.permute.xlu1 %1915 }
  0x7d   :  { %v1918_v44 = vunpack.i.h.bf16 %v1916_v39  ;;  %v1917_v45 = vunpack.i.l.bf16 %v1916_v39  ;;  %v271_v50 = vsel %vm66_vm4, %v222_v47, %v1912_v41  ;;  %v272_v51 = vsel %vm66_vm4, %v217_v46, %v1913_v40 }
  0x7f   :  { %v274_v48 = vsel %vm273_vm5, %v269_v42, %v1917_v45  ;;  %v275_v49 = vsel %vm273_vm5, %v270_v43, %v1918_v44  ;;  %v195_v44 = vld [vmem:[%s2766_s2] sm:$0x1]  ;;  %v2293_v45 = vsub.s32 0, %v2183_v7 }
  0x80   :  { %v1921_v52 = vpop.permute.xlu1 %1920  ;;  %v278_v53 = vpack.c.bf16 %v275_v49, %v274_v48  ;;  %v196_v48 = vld [vmem:[%s2767_s3] sm:$0x1] }
  0x81   :  { %v1923_v54 = vunpack.i.h.bf16 %v1921_v52  ;;  %v1922_v55 = vunpack.i.l.bf16 %v1921_v52 }
  0x82   :  { %1815 = vmatprep.mubr.msk.bf16.mxu1 %vm316_vm6, %v278_v53 }
  0x83   :  { %v277_v56 = vsel %vm273_vm5, %v272_v51, %v1923_v54  ;;  %v276_v57 = vsel %vm273_vm5, %v271_v50, %v1922_v55  ;;  %v2036_v51 = vld [vmem:[%s2768_s4 + $0x20] sm:$0xff]  }
  0x84   :  { %v279_v58 = vpack.c.bf16 %v277_v56, %v276_v57  ;;  %1827 = vmatprep.subr.bf16.mxu0 %v2036_v51 }
  0x85   :  { %1828 = vmatpush3.bf16.msra.mxu0 %v2036_v51 }
  0x86   :  { %1816 = vmatmul.mubr.msk.bf16.vlgmr.msra.gmra.mrb[0].mxu1 %vm316_vm6, %v279_v58  ;;  %1829 = vmatprep.subr.bf16.mxu0 %v2037_v62 }
  0x89   :  { %1830 = vmatpush3.bf16.msra.mxu0 %v2037_v62 }
 0x159   :  { %v1817_v3 = vpop.f32.mrb[0].mxu1 }
 0x15a   :  { %v357_v4 = vpop.f32.mrb[1].mxu1  ;;  %v387_v9 = vmul.f32 %v1817_v3, %v1817_v3  ;;  %v375_v15 = vsel %vm66_vm4, %v1817_v3, 0.0 }
 0x15b   :  { %v385_v5 = vmul.f32 %v357_v4, %v357_v4  ;;  %v1818_v6 = vpop.f32.mrb[2].mxu1  ;;  %v372_v10 = vsel %vm66_vm4, %v357_v4, 0.0 }
 0x15c   :  { %v360_v8 = vpop.f32.mrb[3].mxu1  ;;  %v388_v17 = vmul.f32 %v1818_v6, %v1818_v6  ;;  %v392_v21 = vsel %vm66_vm4, %v387_v9, 0.0  ;;  %v377_v22 = vsel %vm66_vm4, %v1818_v6, 0.0 }
 0x15d   :  { %v373_v11 = vsel %vm66_vm4, %v360_v8, 0.0  ;;  %v386_v12 = vmul.f32 %v360_v8, %v360_v8  ;;  %v389_v16 = vsel %vm66_vm4, %v385_v5, 0.0 }
 0x15e   :  { %v374_v13 = vadd.f32 %v373_v11, %v372_v10  ;;  %v394_v25 = vsel %vm66_vm4, %v388_v17, 0.0 }
 0x15f   :  { %v390_v18 = vsel %vm66_vm4, %v386_v12, 0.0 }
 0x160   :  { %v376_v19 = vadd.f32 %v375_v15, %v374_v13  ;;  %v391_v20 = vadd.f32 %v390_v18, %v389_v16 }
 0x162   :  { %v378_v23 = vadd.f32 %v377_v22, %v376_v19  ;;  %v393_v24 = vadd.f32 %v392_v21, %v391_v20 }
 0x164   :  { %v379_v26 = vrot.slane %v378_v23, 4  ;;  %v395_v27 = vadd.f32 %v394_v25, %v393_v24 }
 0x166   :  { %v380_v28 = vadd.f32 %v379_v26, %v378_v23  ;;  %v396_v29 = vrot.slane %v395_v27, 4 }
 0x168   :  { %v381_v30 = vrot.slane %v380_v28, 2  ;;  %v397_v31 = vadd.f32 %v396_v29, %v395_v27  ;;  %v2330_v27 = vpop.f32.mrb[0].mxu0 }
 0x169   :  { %v139_v29 = vmul.f32 %v2330_v27, %v2330_v27 }
 0x16a   :  { %v382_v32 = vadd.f32 %v381_v30, %v380_v28  ;;  %v398_v33 = vrot.slane %v397_v31, 2  ;;  %v2332_v28 = vpop.f32.mrb[1].mxu0 }
 0x16b   :  { %v124_v30 = vsel %vm66_vm4, %v2332_v28, 0.0 }
 0x16c   :  { %v383_v34 = vrot.slane %v382_v32, 1  ;;  %v399_v35 = vadd.f32 %v398_v33, %v397_v31  ;;  %v137_v31 = vmul.f32 %v2332_v28, %v2332_v28  ;;  %v127_v33 = vsel %vm66_vm4, %v2330_v27, 0.0 }
 0x16e   :  { %v384_v36 = vadd.f32 %v383_v34, %v382_v32  ;;  %v400_v37 = vrot.slane %v399_v35, 1  ;;  %v2340_v32 = vpop.f32.mrb[2].mxu0 }
 0x16f   :  { %v2344_v34 = vpop.f32.mrb[3].mxu0 }
 0x170   :  { %v401_v38 = vadd.f32 %v400_v37, %v399_v35  ;;  %v402_v39 = vmul.f32 0.03125, %v384_v36  ;;  %v141_v35 = vsel %vm66_vm4, %v137_v31, 0.0  ;;  %v140_v36 = vmul.f32 %v2340_v32, %v2340_v32  ;;  %v122_v31 = vld [vmem:[%s2772_s8] sm:$0x1] }
 0x171   :  { %v125_v37 = vsel %vm66_vm4, %v2344_v34, 0.0 }
 0x172   :  { %v403_v40 = vmul.f32 0.03125, %v401_v38  ;;  %v404_v41 = vmul.f32 %v402_v39, %v402_v39  ;;  %v138_v38 = vmul.f32 %v2344_v34, %v2344_v34 }
 0x174   :  { %v405_v42 = vsub.f32 %v403_v40, %v404_v41  ;;  %v144_v40 = vsel %vm66_vm4, %v139_v29, 0.0  ;;  %v129_v41 = vsel %vm66_vm4, %v2340_v32, 0.0 }
 0x176   :  { %v406_v43 = vadd.f32 1e-05, %v405_v42  ;;  %v142_v42 = vsel %vm66_vm4, %v138_v38, 0.0 }
 0x178   :  { %2062 = vrsqrt.f32 %v406_v43 }
 0x182   :  { %v2063_v46 = vpop.eup %2062 }
 0x183   :  { %v408_v47 = vmul.f32 %v2063_v46, %v195_v44  ;;  %v143_v44 = vadd.f32 %v142_v42, %v141_v35  ;;  %v146_v46 = vsel %vm66_vm4, %v140_v36, 0.0  ;;  %v123_v36 = vld [vmem:[%s2773_s9] sm:$0x1] }
 0x185   :  { %v413_v49 = vrot.slane %v408_v47, %v2293_v45  ;;  %v419_v50 = vmul.f32 %v408_v47, %v402_v39  ;;  %v126_v39 = vadd.f32 %v125_v37, %v124_v30 }
 0x187   :  { %v416_v52 = vmul.f32 %v413_v49, %v360_v8  ;;  %v420_v53 = vsub.f32 %v196_v48, %v419_v50  ;;  %v417_v54 = vmul.f32 %v1817_v3, %v413_v49  ;;  %v418_v55 = vmul.f32 %v1818_v6, %v413_v49 }
 0x188   :  { %v415_v56 = vmul.f32 %v413_v49, %v357_v4  ;;  %v128_v43 = vadd.f32 %v127_v33, %v126_v39  ;;  %v145_v48 = vadd.f32 %v144_v40, %v143_v44 }
 0x189   :  { %v425_v57 = vrot.slane %v420_v53, %v2293_v45 }
 0x18a   :  { %v130_v47 = vadd.f32 %v129_v41, %v128_v43  ;;  %v147_v50 = vadd.f32 %v146_v46, %v145_v48 }
 0x18b   :  { %v428_v58 = vadd.f32 %v425_v57, %v416_v52  ;;  %v429_v59 = vadd.f32 %v425_v57, %v417_v54  ;;  %v430_v60 = vadd.f32 %v425_v57, %v418_v55  ;;  %v427_v61 = vadd.f32 %v425_v57, %v415_v56 }
 0x18c   :  { %v131_v49 = vrot.slane %v130_v47, 4  ;;  %v148_v52 = vrot.slane %v147_v50, 4 }
 0x18d   :  { %v432_v63 = vmax.f32 %v428_v58, 0.0  ;;  %v433_v2 = vmax.f32 %v429_v59, 0.0  ;;  %v434_v0 = vmax.f32 %v430_v60, 0.0  ;;  %v431_v1 = vmax.f32 %v427_v61, 0.0 }
 0x18e   :  { %v132_v51 = vadd.f32 %v131_v49, %v130_v47  ;;  %v149_v54 = vadd.f32 %v148_v52, %v147_v50  ;;  %v2039_v50 = vld [vmem:[%s2765_s1 + $0x38] sm:$0xff]  }
 0x18f   :  { %v437_v3 = vrot.slane %v432_v63, 7  ;;  %v1929_v5 = vpack.i.bf16 %v434_v0, %v433_v2  ;;  %v1924_v4 = vpack.i.bf16 %v432_v63, %v431_v1  ;;  %v448_v6 = vrot.slane %v433_v2, 1 }
 0x190   :  { %v450_v8 = vrot.slane %v434_v0, 1  ;;  %v447_v9 = vrot.slane %v431_v1, 1  ;;  %v449_v10 = vrot.slane %v432_v63, 1  ;;  %v438_v11 = vrot.slane %v434_v0, 7 }
 0x191   :  { %1930 = vrot.lane.b32.xlu1 %v1929_v5, %s2100_s23  ;;  %1925 = vrot.lane.b32.xlu0 %v1924_v4, %s2100_s23  ;;  %v436_v12 = vrot.slane %v433_v2, 7  ;;  %v435_v13 = vrot.slane %v431_v1, 7  ;;  %v133_v53 = vrot.slane %v132_v51, 2  ;;  %v150_v60 = vrot.slane %v149_v54, 2 }
 0x192   :  { %v452_v15 = vsel %vm228_vm0, %v448_v6, %v450_v8  ;;  %v454_v16 = vsel %vm228_vm0, %v450_v8, %v448_v6  ;;  %v451_v17 = vsel %vm228_vm0, %v447_v9, %v449_v10  ;;  %v453_v18 = vsel %vm228_vm0, %v449_v10, %v447_v9 }
 0x193   :  { %v458_v19 = vsel %vm43_vm1, %v454_v16, 0.0  ;;  %v456_v20 = vsel %vm43_vm1, %v453_v18, 0.0  ;;  %v440_v21 = vsel %vm215_vm2, %v436_v12, %v438_v11  ;;  %v442_v22 = vsel %vm215_vm2, %v438_v11, %v436_v12 }
 0x194   :  { %v1939_v23 = vpack.i.bf16 %v458_v19, %v452_v15  ;;  %v1934_v24 = vpack.i.bf16 %v456_v20, %v451_v17  ;;  %v439_v25 = vsel %vm215_vm2, %v435_v13, %v437_v3  ;;  %v441_v26 = vsel %vm215_vm2, %v437_v3, %v435_v13 }
 0x195   :  { %v134_v59 = vadd.f32 %v133_v53, %v132_v51  ;;  %v445_v63 = vsel %vm40_vm3, %v442_v22, 0.0  ;;  %v151_v0 = vadd.f32 %v150_v60, %v149_v54  ;;  %v443_v5 = vsel %vm40_vm3, %v441_v26, 0.0 }
 0x196   :  { %1940 = vrot.lane.b32.xlu1 %v1939_v23, %s2101_s29  ;;  %1935 = vrot.lane.b32.xlu0 %v1934_v24, %s2101_s29 }
 0x197   :  { %v135_v2 = vrot.slane %v134_v59, 1  ;;  %v152_v16 = vrot.slane %v151_v0, 1 }
 0x199   :  { %v136_v15 = vadd.f32 %v135_v2, %v134_v59  ;;  %v153_v23 = vadd.f32 %v152_v16, %v151_v0 }
 0x19b   :  { %v154_v24 = vmul.f32 0.03125, %v136_v15  ;;  %v155_v26 = vmul.f32 0.03125, %v153_v23 }
 0x19d   :  { %v156_v29 = vmul.f32 %v154_v24, %v154_v24 }
 0x203   :  { %v1931_v55 = vpop.permute.xlu1 %1930  ;;  %v1926_v56 = vpop.permute.xlu0 %1925 }
 0x204   :  { %v1933_v57 = vunpack.i.h.bf16 %v1931_v55  ;;  %v1932_v58 = vunpack.i.l.bf16 %v1931_v55  ;;  %v1928_v61 = vunpack.i.h.bf16 %v1926_v56  ;;  %v1927_v62 = vunpack.i.l.bf16 %v1926_v56 }
 0x206   :  { %v493_v1 = vsel %vm66_vm4, %v445_v63, %v1932_v58  ;;  %v494_v3 = vsel %vm66_vm4, %v440_v21, %v1933_v57  ;;  %v491_v12 = vsel %vm66_vm4, %v443_v5, %v1927_v62  ;;  %v492_v13 = vsel %vm66_vm4, %v439_v25, %v1928_v61 }
 0x207   :  { %v157_v25 = vsub.f32 %v155_v26, %v156_v29 }
 0x208   :  { %v1941_v4 = vpop.permute.xlu1 %1940  ;;  %v1936_v6 = vpop.permute.xlu0 %1935 }
 0x209   :  { %v1943_v8 = vunpack.i.h.bf16 %v1941_v4  ;;  %v1942_v9 = vunpack.i.l.bf16 %v1941_v4  ;;  %v1938_v10 = vunpack.i.h.bf16 %v1936_v6  ;;  %v1937_v11 = vunpack.i.l.bf16 %v1936_v6 }
 0x20a   :  { %v158_v30 = vadd.f32 1e-05, %v157_v25  ;;  %v209_v25 = vld [vmem:[%s2769_s5] sm:$0x1] }
 0x20b   :  { %v497_v17 = vsel %vm273_vm5, %v493_v1, %v1942_v9  ;;  %v498_v18 = vsel %vm273_vm5, %v494_v3, %v1943_v8  ;;  %v495_v19 = vsel %vm273_vm5, %v491_v12, %v1937_v11  ;;  %v496_v20 = vsel %vm273_vm5, %v492_v13, %v1938_v10 }
 0x20c   :  { %v500_v21 = vpack.c.bf16 %v498_v18, %v497_v17  ;;  %v499_v22 = vpack.c.bf16 %v496_v20, %v495_v19  ;;  %2064 = vrsqrt.f32 %v158_v30 }
 0x20e   :  { %1831 = vmatprep.mubr.msk.bf16.mxu0 %vm316_vm6, %v499_v22 }
 0x20f   :  { %1832 = vmatmul.mubr.msk.bf16.vlgmr.msra.gmra.mrb[4].mxu0 %vm316_vm6, %v500_v21 }
 0x216   :  { %v2065_v33 = vpop.eup %2064 }
 0x217   :  { %v160_v35 = vmul.f32 %v2065_v33, %v122_v31  ;;  %v210_v33 = vld [vmem:[%s2770_s6] sm:$0x1] }
 0x219   :  { %v165_v37 = vrot.slane %v160_v35, %v2293_v45  ;;  %v171_v38 = vmul.f32 %v160_v35, %v154_v24 }
 0x21b   :  { %v168_v39 = vmul.f32 %v165_v37, %v2344_v34  ;;  %v172_v40 = vsub.f32 %v123_v36, %v171_v38  ;;  %v169_v43 = vmul.f32 %v2330_v27, %v165_v37  ;;  %v170_v44 = vmul.f32 %v2340_v32, %v165_v37  ;;  %v2038_v34 = vld [vmem:[%s2765_s1 + $0x30] sm:$0xff]   ;;  %v2040_v27 = vld [vmem:[%s2765_s1 + $0x40] sm:$0xff]  }
 0x21c   :  { %v167_v46 = vmul.f32 %v165_v37, %v2332_v28  ;;  %1835 = vmatprep.subr.bf16.mxu1 %v2038_v34  ;;  %v2041_v28 = vld [vmem:[%s2765_s1 + $0x48] sm:$0xff]  }
 0x21d   :  { %v177_v41 = vrot.slane %v172_v40, %v2293_v45  ;;  %1836 = vmatpush3.bf16.msra.mxu1 %v2038_v34 }
 0x21e   :  { %1837 = vmatprep.subr.bf16.mxu1 %v2039_v50 }
 0x21f   :  { %v2381_v42 = vadd.f32 %v177_v41, %v168_v39  ;;  %v2386_v47 = vadd.f32 %v177_v41, %v169_v43  ;;  %v2388_v48 = vadd.f32 %v177_v41, %v170_v44  ;;  %v2390_v49 = vadd.f32 %v177_v41, %v167_v46  ;;  %v2042_v43 = vld [vmem:[%s2765_s1 + $0x50] sm:$0xff]  }
 0x221   :  { %1838 = vmatpush3.bf16.msra.mxu1 %v2039_v50 }
 0x222   :  { %1839 = vmatprep.subr.bf16.mxu1 %v2040_v27 }
 0x225   :  { %1840 = vmatpush3.bf16.msra.mxu1 %v2040_v27 }
 0x226   :  { %1841 = vmatprep.subr.bf16.mxu1 %v2041_v28 }
 0x229   :  { %1842 = vmatpush3.bf16.msra.mxu1 %v2041_v28 }
 0x22a   :  { %1843 = vmatprep.subr.bf16.mxu1 %v2042_v43 }
 0x22d   :  { %1844 = vmatpush3.bf16.msra.mxu1 %v2042_v43  ;;  %v2044_v43 = vld [vmem:[%s2768_s4 + $0x30] sm:$0xff]  }
 0x22e   :  { %1851 = vmatprep.subr.bf16.mxu0 %v2044_v43 }
 0x22f   :  { %1852 = vmatpush3.bf16.msra.mxu0 %v2044_v43 }
 0x2e2   :  { %v1833_v32 = vpop.f32.mrb[4].mxu0 }
 0x2e3   :  { %v577_v51 = vpop.f32.mrb[5].mxu0  ;;  %v607_v55 = vmul.f32 %v1833_v32, %v1833_v32  ;;  %v595_v60 = vsel %vm66_vm4, %v1833_v32, 0.0 }
 0x2e4   :  { %v605_v52 = vmul.f32 %v577_v51, %v577_v51  ;;  %v1834_v53 = vpop.f32.mrb[6].mxu0  ;;  %v592_v56 = vsel %vm66_vm4, %v577_v51, 0.0 }
 0x2e5   :  { %v580_v54 = vpop.f32.mrb[7].mxu0  ;;  %v608_v62 = vmul.f32 %v1834_v53, %v1834_v53  ;;  %v612_v1 = vsel %vm66_vm4, %v607_v55, 0.0  ;;  %v597_v3 = vsel %vm66_vm4, %v1834_v53, 0.0 }
 0x2e6   :  { %v593_v57 = vsel %vm66_vm4, %v580_v54, 0.0  ;;  %v606_v58 = vmul.f32 %v580_v54, %v580_v54  ;;  %v609_v61 = vsel %vm66_vm4, %v605_v52, 0.0 }
 0x2e7   :  { %v594_v59 = vadd.f32 %v593_v57, %v592_v56  ;;  %v614_v6 = vsel %vm66_vm4, %v608_v62, 0.0 }
 0x2e8   :  { %v610_v63 = vsel %vm66_vm4, %v606_v58, 0.0 }
 0x2e9   :  { %v596_v2 = vadd.f32 %v595_v60, %v594_v59  ;;  %v611_v0 = vadd.f32 %v610_v63, %v609_v61 }
 0x2eb   :  { %v598_v5 = vadd.f32 %v597_v3, %v596_v2  ;;  %v613_v4 = vadd.f32 %v612_v1, %v611_v0 }
 0x2ed   :  { %v599_v8 = vrot.slane %v598_v5, 4  ;;  %v615_v9 = vadd.f32 %v614_v6, %v613_v4 }
 0x2ef   :  { %v600_v10 = vadd.f32 %v599_v8, %v598_v5  ;;  %v616_v11 = vrot.slane %v615_v9, 4 }
 0x2f1   :  { %v601_v12 = vrot.slane %v600_v10, 2  ;;  %v617_v13 = vadd.f32 %v616_v11, %v615_v9 }
 0x2f3   :  { %v602_v15 = vadd.f32 %v601_v12, %v600_v10  ;;  %v618_v16 = vrot.slane %v617_v13, 2 }
 0x2f5   :  { %v603_v17 = vrot.slane %v602_v15, 1  ;;  %v619_v18 = vadd.f32 %v618_v16, %v617_v13 }
 0x2f7   :  { %v604_v19 = vadd.f32 %v603_v17, %v602_v15  ;;  %v620_v20 = vrot.slane %v619_v18, 1 }
 0x2f9   :  { %v621_v21 = vadd.f32 %v620_v20, %v619_v18  ;;  %v622_v22 = vmul.f32 0.03125, %v604_v19 }
 0x2fb   :  { %v623_v23 = vmul.f32 0.03125, %v621_v21  ;;  %v624_v24 = vmul.f32 %v622_v22, %v622_v22 }
 0x2fd   :  { %v625_v26 = vsub.f32 %v623_v23, %v624_v24 }
 0x2ff   :  { %v626_v29 = vadd.f32 1e-05, %v625_v26 }
 0x301   :  { %2066 = vrsqrt.f32 %v626_v29 }
 0x30b   :  { %v2067_v30 = vpop.eup %2066 }
 0x30c   :  { %v628_v31 = vmul.f32 %v2067_v30, %v209_v25 }
 0x30e   :  { %v633_v35 = vrot.slane %v628_v31, %v2293_v45  ;;  %v639_v36 = vmul.f32 %v628_v31, %v622_v22 }
 0x310   :  { %v636_v37 = vmul.f32 %v633_v35, %v580_v54  ;;  %v640_v38 = vsub.f32 %v210_v33, %v639_v36  ;;  %v637_v39 = vmul.f32 %v1833_v32, %v633_v35  ;;  %v638_v40 = vmul.f32 %v1834_v53, %v633_v35  ;;  %v2043_v53 = vld [vmem:[%s2765_s1 + $0x58] sm:$0xff]  }
 0x311   :  { %v635_v41 = vmul.f32 %v633_v35, %v577_v51  ;;  %1845 = vmatprep.subr.bf16.mxu1 %v2043_v53 }
 0x312   :  { %v645_v44 = vrot.slane %v640_v38, %v2293_v45  ;;  %1846 = vmatpush3.bf16.msra.mxu1 %v2043_v53 }
 0x314   :  { %v648_v46 = vadd.f32 %v645_v44, %v636_v37  ;;  %v649_v34 = vadd.f32 %v645_v44, %v637_v39  ;;  %v650_v50 = vadd.f32 %v645_v44, %v638_v40  ;;  %v647_v27 = vadd.f32 %v645_v44, %v635_v41  ;;  %v2045_v44 = vld [vmem:[%s2768_s4 + $0x38] sm:$0xff]  }
 0x315   :  { %1853 = vmatprep.subr.bf16.mxu0 %v2045_v44 }
 0x316   :  { %v652_v28 = vadd.f32 %v648_v46, %v2381_v42  ;;  %v653_v52 = vadd.f32 %v649_v34, %v2386_v47  ;;  %v654_v32 = vadd.f32 %v650_v50, %v2388_v48  ;;  %v651_v51 = vadd.f32 %v647_v27, %v2390_v49  ;;  %v2046_v46 = vld [vmem:[%s2768_s4 + $0x40] sm:$0xff]   ;;  %1854 = vmatpush3.bf16.msra.mxu0 %v2045_v44  ;;  %v2047_v34 = vld [vmem:[%s2768_s4 + $0x48] sm:$0xff]  }
 0x317   :  { %1855 = vmatprep.subr.bf16.mxu0 %v2046_v46 }
 0x318   :  { %v2430_v54 = vmax.f32 %v652_v28, 0.0  ;;  %v2432_v55 = vmax.f32 %v653_v52, 0.0  ;;  %v2434_v56 = vmax.f32 %v654_v32, 0.0  ;;  %v2436_v57 = vmax.f32 %v651_v51, 0.0 }
 0x31a   :  { %v1949_v42 = vpack.i.bf16 %v2434_v56, %v2432_v55  ;;  %v1944_v47 = vpack.i.bf16 %v2430_v54, %v2436_v57  ;;  %v706_v48 = vrot.slane %v2432_v55, 1  ;;  %v708_v49 = vrot.slane %v2434_v56, 1  ;;  %1856 = vmatpush3.bf16.msra.mxu0 %v2046_v46 }
 0x31b   :  { %v705_v58 = vrot.slane %v2436_v57, 1  ;;  %v707_v59 = vrot.slane %v2430_v54, 1  ;;  %v696_v5 = vrot.slane %v2434_v56, 7  ;;  %v694_v4 = vrot.slane %v2432_v55, 7  ;;  %1857 = vmatprep.subr.bf16.mxu0 %v2047_v34 }
 0x31c   :  { %1950 = vrot.lane.b32.xlu1 %v1949_v42, %s2100_s23  ;;  %1945 = vrot.lane.b32.xlu0 %v1944_v47, %s2100_s23  ;;  %v710_v60 = vsel %vm228_vm0, %v706_v48, %v708_v49  ;;  %v712_v61 = vsel %vm228_vm0, %v708_v49, %v706_v48  ;;  %v695_v6 = vrot.slane %v2430_v54, 7  ;;  %v693_v8 = vrot.slane %v2436_v57, 7 }
 0x31d   :  { %v716_v62 = vsel %vm43_vm1, %v712_v61, 0.0  ;;  %v709_v63 = vsel %vm228_vm0, %v705_v58, %v707_v59  ;;  %v711_v2 = vsel %vm228_vm0, %v707_v59, %v705_v58  ;;  %v700_v13 = vsel %vm215_vm2, %v696_v5, %v694_v4 }
 0x31e   :  { %v1959_v0 = vpack.i.bf16 %v716_v62, %v710_v60  ;;  %v714_v1 = vsel %vm43_vm1, %v711_v2, 0.0  ;;  %v699_v15 = vsel %vm215_vm2, %v695_v6, %v693_v8  ;;  %v698_v18 = vsel %vm215_vm2, %v694_v4, %v696_v5  ;;  %1858 = vmatpush3.bf16.msra.mxu0 %v2047_v34  ;;  %v2049_v34 = vld [vmem:[%s2768_s4 + $0x58] sm:$0xff]  }
 0x31f   :  { %v1954_v3 = vpack.i.bf16 %v714_v1, %v709_v63  ;;  %v697_v19 = vsel %vm215_vm2, %v693_v8, %v695_v6  ;;  %v703_v21 = vsel %vm40_vm3, %v700_v13, 0.0  ;;  %v701_v22 = vsel %vm40_vm3, %v699_v15, 0.0 }
 0x320   :  { %1960 = vrot.lane.b32.xlu1 %v1959_v0, %s2101_s29 }
 0x321   :  { %1955 = vrot.lane.b32.xlu0 %v1954_v3, %s2101_s29 }
 0x38e   :  { %v1951_v9 = vpop.permute.xlu1 %1950  ;;  %v1946_v10 = vpop.permute.xlu0 %1945 }
 0x38f   :  { %v1953_v11 = vunpack.i.h.bf16 %v1951_v9  ;;  %v1952_v12 = vunpack.i.l.bf16 %v1951_v9  ;;  %v1948_v16 = vunpack.i.h.bf16 %v1946_v10  ;;  %v1947_v17 = vunpack.i.l.bf16 %v1946_v10 }
 0x391   :  { %v751_v29 = vsel %vm66_vm4, %v703_v21, %v1952_v12  ;;  %v752_v25 = vsel %vm66_vm4, %v698_v18, %v1953_v11  ;;  %v749_v33 = vsel %vm66_vm4, %v701_v22, %v1947_v17  ;;  %v750_v35 = vsel %vm66_vm4, %v697_v19, %v1948_v16 }
 0x392   :  { %v1961_v20 = vpop.permute.xlu1 %1960 }
 0x393   :  { %v1963_v23 = vunpack.i.h.bf16 %v1961_v20  ;;  %v1962_v24 = vunpack.i.l.bf16 %v1961_v20  ;;  %v1956_v26 = vpop.permute.xlu0 %1955 }
 0x394   :  { %v1958_v30 = vunpack.i.h.bf16 %v1956_v26  ;;  %v1957_v31 = vunpack.i.l.bf16 %v1956_v26 }
 0x395   :  { %v755_v36 = vsel %vm273_vm5, %v751_v29, %v1962_v24  ;;  %v756_v37 = vsel %vm273_vm5, %v752_v25, %v1963_v23  ;;  %v1667_v24 = vld [vmem:[%s2766_s2 + $0x1] sm:$0x1] }
 0x396   :  { %v758_v38 = vpack.c.bf16 %v756_v37, %v755_v36  ;;  %v753_v39 = vsel %vm273_vm5, %v749_v33, %v1957_v31  ;;  %v754_v40 = vsel %vm273_vm5, %v750_v35, %v1958_v30  ;;  %v1668_v25 = vld [vmem:[%s2767_s3 + $0x1] sm:$0x1]  ;;  %v2048_v33 = vld [vmem:[%s2768_s4 + $0x50] sm:$0xff]  }
 0x397   :  { %v757_v41 = vpack.c.bf16 %v754_v40, %v753_v39  ;;  %1859 = vmatprep.subr.bf16.mxu0 %v2048_v33 }
 0x398   :  { %1860 = vmatpush3.bf16.msra.mxu0 %v2048_v33 }
 0x399   :  { %1847 = vmatprep.mubr.msk.bf16.mxu1 %vm316_vm6, %v757_v41  ;;  %1861 = vmatprep.subr.bf16.mxu0 %v2049_v34 }
 0x39a   :  { %1848 = vmatmul.mubr.msk.bf16.vlgmr.msra.gmra.mrb[4].mxu1 %vm316_vm6, %v758_v38 }
 0x39c   :  { %1862 = vmatpush3.bf16.msra.mxu0 %v2049_v34 }
 0x46d   :  { %v1849_v50 = vpop.f32.mrb[4].mxu1 }
 0x46e   :  { %v835_v27 = vpop.f32.mrb[5].mxu1  ;;  %v865_v51 = vmul.f32 %v1849_v50, %v1849_v50  ;;  %v853_v49 = vsel %vm66_vm4, %v1849_v50, 0.0 }
 0x46f   :  { %v863_v28 = vmul.f32 %v835_v27, %v835_v27  ;;  %v1850_v52 = vpop.f32.mrb[6].mxu1  ;;  %v850_v53 = vsel %vm66_vm4, %v835_v27, 0.0 }
 0x470   :  { %v838_v32 = vpop.f32.mrb[7].mxu1  ;;  %v866_v59 = vmul.f32 %v1850_v52, %v1850_v52  ;;  %v870_v63 = vsel %vm66_vm4, %v865_v51, 0.0  ;;  %v855_v2 = vsel %vm66_vm4, %v1850_v52, 0.0 }
 0x471   :  { %v851_v42 = vsel %vm66_vm4, %v838_v32, 0.0  ;;  %v864_v47 = vmul.f32 %v838_v32, %v838_v32  ;;  %v867_v58 = vsel %vm66_vm4, %v863_v28, 0.0 }
 0x472   :  { %v852_v48 = vadd.f32 %v851_v42, %v850_v53  ;;  %v872_v3 = vsel %vm66_vm4, %v866_v59, 0.0 }
 0x473   :  { %v868_v60 = vsel %vm66_vm4, %v864_v47, 0.0 }
 0x474   :  { %v854_v61 = vadd.f32 %v853_v49, %v852_v48  ;;  %v869_v62 = vadd.f32 %v868_v60, %v867_v58 }
 0x476   :  { %v856_v0 = vadd.f32 %v855_v2, %v854_v61  ;;  %v871_v1 = vadd.f32 %v870_v63, %v869_v62 }
 0x478   :  { %v857_v5 = vrot.slane %v856_v0, 4  ;;  %v873_v4 = vadd.f32 %v872_v3, %v871_v1 }
 0x47a   :  { %v858_v6 = vadd.f32 %v857_v5, %v856_v0  ;;  %v874_v8 = vrot.slane %v873_v4, 4 }
 0x47c   :  { %v859_v9 = vrot.slane %v858_v6, 2  ;;  %v875_v10 = vadd.f32 %v874_v8, %v873_v4 }
 0x47e   :  { %v860_v11 = vadd.f32 %v859_v9, %v858_v6  ;;  %v876_v12 = vrot.slane %v875_v10, 2 }
 0x480   :  { %v861_v13 = vrot.slane %v860_v11, 1  ;;  %v877_v15 = vadd.f32 %v876_v12, %v875_v10 }
 0x482   :  { %v862_v16 = vadd.f32 %v861_v13, %v860_v11  ;;  %v878_v17 = vrot.slane %v877_v15, 1 }
 0x484   :  { %v879_v18 = vadd.f32 %v878_v17, %v877_v15  ;;  %v880_v19 = vmul.f32 0.03125, %v862_v16 }
 0x486   :  { %v881_v20 = vmul.f32 0.03125, %v879_v18  ;;  %v882_v21 = vmul.f32 %v880_v19, %v880_v19 }
 0x488   :  { %v883_v22 = vsub.f32 %v881_v20, %v882_v21 }
 0x48a   :  { %v884_v23 = vadd.f32 1e-05, %v883_v22 }
 0x48c   :  { %2068 = vrsqrt.f32 %v884_v23 }
 0x496   :  { %v2069_v26 = vpop.eup %2068 }
 0x497   :  { %v886_v29 = vmul.f32 %v2069_v26, %v1667_v24 }
 0x499   :  { %v891_v30 = vrot.slane %v886_v29, %v2293_v45  ;;  %v897_v31 = vmul.f32 %v886_v29, %v880_v19 }
 0x49b   :  { %v894_v35 = vmul.f32 %v891_v30, %v838_v32  ;;  %v898_v36 = vsub.f32 %v1668_v25, %v897_v31  ;;  %v895_v37 = vmul.f32 %v1849_v50, %v891_v30  ;;  %v896_v38 = vmul.f32 %v1850_v52, %v891_v30 }
 0x49c   :  { %v893_v39 = vmul.f32 %v891_v30, %v835_v27 }
 0x49d   :  { %v903_v40 = vrot.slane %v898_v36, %v2293_v45 }
 0x49f   :  { %v906_v41 = vadd.f32 %v903_v40, %v894_v35  ;;  %v907_v43 = vadd.f32 %v903_v40, %v895_v37  ;;  %v908_v44 = vadd.f32 %v903_v40, %v896_v38  ;;  %v905_v46 = vadd.f32 %v903_v40, %v893_v39  ;;  %v2050_v39 = vld [vmem:[%s2765_s1 + $0x60] sm:$0xff]   ;;  %v2051_v40 = vld [vmem:[%s2765_s1 + $0x68] sm:$0xff]  }
 0x4a0   :  { %1867 = vmatprep.subr.bf16.mxu1 %v2050_v39 }
 0x4a1   :  { %v910_v28 = vmax.f32 %v906_v41, 0.0  ;;  %v911_v51 = vmax.f32 %v907_v43, 0.0  ;;  %v912_v53 = vmax.f32 %v908_v44, 0.0  ;;  %v909_v32 = vmax.f32 %v905_v46, 0.0  ;;  %1868 = vmatpush3.bf16.msra.mxu1 %v2050_v39  ;;  %v2052_v41 = vld [vmem:[%s2765_s1 + $0x70] sm:$0xff]   ;;  %v2053_v43 = vld [vmem:[%s2765_s1 + $0x78] sm:$0xff]  }
 0x4a2   :  { %1869 = vmatprep.subr.bf16.mxu1 %v2051_v40 }
 0x4a3   :  { %v915_v50 = vrot.slane %v910_v28, 7  ;;  %v1969_v52 = vpack.i.bf16 %v912_v53, %v911_v51  ;;  %v1964_v27 = vpack.i.bf16 %v910_v28, %v909_v32  ;;  %v926_v42 = vrot.slane %v911_v51, 1 }
 0x4a4   :  { %v928_v47 = vrot.slane %v912_v53, 1  ;;  %v925_v48 = vrot.slane %v909_v32, 1  ;;  %v927_v49 = vrot.slane %v910_v28, 1  ;;  %v916_v58 = vrot.slane %v912_v53, 7 }
 0x4a5   :  { %1970 = vrot.lane.b32.xlu1 %v1969_v52, %s2100_s23  ;;  %1965 = vrot.lane.b32.xlu0 %v1964_v27, %s2100_s23  ;;  %v914_v59 = vrot.slane %v911_v51, 7  ;;  %v913_v60 = vrot.slane %v909_v32, 7 }
 0x4a6   :  { %v930_v61 = vsel %vm228_vm0, %v926_v42, %v928_v47  ;;  %v932_v62 = vsel %vm228_vm0, %v928_v47, %v926_v42  ;;  %v929_v63 = vsel %vm228_vm0, %v925_v48, %v927_v49  ;;  %v931_v2 = vsel %vm228_vm0, %v927_v49, %v925_v48  ;;  %1870 = vmatpush3.bf16.msra.mxu1 %v2051_v40 }
 0x4a7   :  { %v936_v0 = vsel %vm43_vm1, %v932_v62, 0.0  ;;  %v934_v1 = vsel %vm43_vm1, %v931_v2, 0.0  ;;  %v918_v3 = vsel %vm215_vm2, %v914_v59, %v916_v58  ;;  %v920_v5 = vsel %vm215_vm2, %v916_v58, %v914_v59  ;;  %1871 = vmatprep.subr.bf16.mxu1 %v2052_v41 }
 0x4a8   :  { %v1979_v4 = vpack.i.bf16 %v936_v0, %v930_v61  ;;  %v1974_v6 = vpack.i.bf16 %v934_v1, %v929_v63  ;;  %v917_v8 = vsel %vm215_vm2, %v913_v60, %v915_v50  ;;  %v919_v9 = vsel %vm215_vm2, %v915_v50, %v913_v60 }
 0x4a9   :  { %v923_v17 = vsel %vm40_vm3, %v920_v5, 0.0  ;;  %v921_v18 = vsel %vm40_vm3, %v919_v9, 0.0 }
 0x4aa   :  { %1980 = vrot.lane.b32.xlu1 %v1979_v4, %s2101_s29  ;;  %1975 = vrot.lane.b32.xlu0 %v1974_v6, %s2101_s29 }
 0x4ab   :  { %1872 = vmatpush3.bf16.msra.mxu1 %v2052_v41 }
 0x4ac   :  { %1873 = vmatprep.subr.bf16.mxu1 %v2053_v43 }
 0x4af   :  { %1874 = vmatpush3.bf16.msra.mxu1 %v2053_v43 }
 0x517   :  { %v1971_v10 = vpop.permute.xlu1 %1970  ;;  %v1966_v11 = vpop.permute.xlu0 %1965 }
 0x518   :  { %v1973_v12 = vunpack.i.h.bf16 %v1971_v10  ;;  %v1972_v13 = vunpack.i.l.bf16 %v1971_v10  ;;  %v1968_v15 = vunpack.i.h.bf16 %v1966_v11  ;;  %v1967_v16 = vunpack.i.l.bf16 %v1966_v11 }
 0x51a   :  { %v971_v26 = vsel %vm66_vm4, %v923_v17, %v1972_v13  ;;  %v972_v29 = vsel %vm66_vm4, %v918_v3, %v1973_v12  ;;  %v969_v25 = vsel %vm66_vm4, %v921_v18, %v1967_v16  ;;  %v970_v30 = vsel %vm66_vm4, %v917_v8, %v1968_v15 }
 0x51c   :  { %v1981_v19 = vpop.permute.xlu1 %1980  ;;  %v1976_v20 = vpop.permute.xlu0 %1975 }
 0x51d   :  { %v1983_v21 = vunpack.i.h.bf16 %v1981_v19  ;;  %v1982_v22 = vunpack.i.l.bf16 %v1981_v19  ;;  %v1978_v23 = vunpack.i.h.bf16 %v1976_v20  ;;  %v1977_v24 = vunpack.i.l.bf16 %v1976_v20 }
 0x51f   :  { %v975_v31 = vsel %vm273_vm5, %v971_v26, %v1982_v22  ;;  %v976_v33 = vsel %vm273_vm5, %v972_v29, %v1983_v21  ;;  %v973_v35 = vsel %vm273_vm5, %v969_v25, %v1977_v24  ;;  %v974_v36 = vsel %vm273_vm5, %v970_v30, %v1978_v23  ;;  %v1681_v21 = vld [vmem:[%s2769_s5 + $0x1] sm:$0x1] }
 0x520   :  { %v978_v37 = vpack.c.bf16 %v976_v33, %v975_v31  ;;  %v977_v38 = vpack.c.bf16 %v974_v36, %v973_v35  ;;  %v1682_v24 = vld [vmem:[%s2770_s6 + $0x1] sm:$0x1] }
 0x521   :  { %v2054_v36 = vld [vmem:[%s2765_s1 + $0x80] sm:$0xff]  }
 0x522   :  { %1863 = vmatprep.mubr.msk.bf16.mxu0 %vm316_vm6, %v977_v38  ;;  %1875 = vmatprep.subr.bf16.mxu1 %v2054_v36 }
 0x523   :  { %1864 = vmatmul.mubr.msk.bf16.vlgmr.msra.gmra.mrb[8].mxu0 %vm316_vm6, %v978_v37  ;;  %1876 = vmatpush3.bf16.msra.mxu1 %v2054_v36  ;;  %v2056_v36 = vld [vmem:[%s2768_s4 + $0x60] sm:$0xff]  }
 0x524   :  { %1883 = vmatprep.subr.bf16.mxu0 %v2056_v36 }
 0x525   :  { %1884 = vmatpush3.bf16.msra.mxu0 %v2056_v36 }
 0x5f6   :  { %v1865_v44 = vpop.f32.mrb[8].mxu0 }
 0x5f7   :  { %v1055_v46 = vpop.f32.mrb[9].mxu0  ;;  %v1085_v53 = vmul.f32 %v1865_v44, %v1865_v44  ;;  %v1073_v42 = vsel %vm66_vm4, %v1865_v44, 0.0 }
 0x5f8   :  { %v1083_v34 = vmul.f32 %v1055_v46, %v1055_v46  ;;  %v1866_v28 = vpop.f32.mrb[10].mxu0  ;;  %v1070_v32 = vsel %vm66_vm4, %v1055_v46, 0.0 }
 0x5f9   :  { %v1058_v51 = vpop.f32.mrb[11].mxu0  ;;  %v1086_v48 = vmul.f32 %v1866_v28, %v1866_v28  ;;  %v1090_v60 = vsel %vm66_vm4, %v1085_v53, 0.0  ;;  %v1075_v61 = vsel %vm66_vm4, %v1866_v28, 0.0 }
 0x5fa   :  { %v1071_v50 = vsel %vm66_vm4, %v1058_v51, 0.0  ;;  %v1084_v52 = vmul.f32 %v1058_v51, %v1058_v51  ;;  %v1087_v47 = vsel %vm66_vm4, %v1083_v34, 0.0 }
 0x5fb   :  { %v1072_v27 = vadd.f32 %v1071_v50, %v1070_v32  ;;  %v1092_v2 = vsel %vm66_vm4, %v1086_v48, 0.0 }
 0x5fc   :  { %v1088_v49 = vsel %vm66_vm4, %v1084_v52, 0.0 }
 0x5fd   :  { %v1074_v58 = vadd.f32 %v1073_v42, %v1072_v27  ;;  %v1089_v59 = vadd.f32 %v1088_v49, %v1087_v47 }
 0x5ff   :  { %v1076_v62 = vadd.f32 %v1075_v61, %v1074_v58  ;;  %v1091_v63 = vadd.f32 %v1090_v60, %v1089_v59 }
 0x601   :  { %v1077_v0 = vrot.slane %v1076_v62, 4  ;;  %v1093_v1 = vadd.f32 %v1092_v2, %v1091_v63 }
 0x603   :  { %v1078_v3 = vadd.f32 %v1077_v0, %v1076_v62  ;;  %v1094_v5 = vrot.slane %v1093_v1, 4 }
 0x605   :  { %v1079_v4 = vrot.slane %v1078_v3, 2  ;;  %v1095_v6 = vadd.f32 %v1094_v5, %v1093_v1 }
 0x607   :  { %v1080_v8 = vadd.f32 %v1079_v4, %v1078_v3  ;;  %v1096_v9 = vrot.slane %v1095_v6, 2 }
 0x609   :  { %v1081_v10 = vrot.slane %v1080_v8, 1  ;;  %v1097_v11 = vadd.f32 %v1096_v9, %v1095_v6 }
 0x60b   :  { %v1082_v12 = vadd.f32 %v1081_v10, %v1080_v8  ;;  %v1098_v13 = vrot.slane %v1097_v11, 1 }
 0x60d   :  { %v1099_v15 = vadd.f32 %v1098_v13, %v1097_v11  ;;  %v1100_v16 = vmul.f32 0.03125, %v1082_v12 }
 0x60f   :  { %v1101_v17 = vmul.f32 0.03125, %v1099_v15  ;;  %v1102_v18 = vmul.f32 %v1100_v16, %v1100_v16 }
 0x611   :  { %v1103_v19 = vsub.f32 %v1101_v17, %v1102_v18 }
 0x613   :  { %v1104_v20 = vadd.f32 1e-05, %v1103_v19 }
 0x615   :  { %2070 = vrsqrt.f32 %v1104_v20 }
 0x61f   :  { %v2071_v22 = vpop.eup %2070 }
 0x620   :  { %v1106_v23 = vmul.f32 %v2071_v22, %v1681_v21 }
 0x622   :  { %v1111_v26 = vrot.slane %v1106_v23, %v2293_v45  ;;  %v1117_v29 = vmul.f32 %v1106_v23, %v1100_v16 }
 0x624   :  { %v1114_v25 = vmul.f32 %v1111_v26, %v1058_v51  ;;  %v1118_v30 = vsub.f32 %v1682_v24, %v1117_v29  ;;  %v1115_v31 = vmul.f32 %v1865_v44, %v1111_v26  ;;  %v1116_v33 = vmul.f32 %v1866_v28, %v1111_v26  ;;  %v2055_v28 = vld [vmem:[%s2765_s1 + $0x88] sm:$0xff]  }
 0x625   :  { %v1113_v35 = vmul.f32 %v1111_v26, %v1055_v46  ;;  %1877 = vmatprep.subr.bf16.mxu1 %v2055_v28 }
 0x626   :  { %v1123_v37 = vrot.slane %v1118_v30, %v2293_v45  ;;  %1878 = vmatpush3.bf16.msra.mxu1 %v2055_v28 }
 0x628   :  { %v1126_v38 = vadd.f32 %v1123_v37, %v1114_v25  ;;  %v1127_v39 = vadd.f32 %v1123_v37, %v1115_v31  ;;  %v1128_v40 = vadd.f32 %v1123_v37, %v1116_v33  ;;  %v1125_v41 = vadd.f32 %v1123_v37, %v1113_v35  ;;  %v2057_v37 = vld [vmem:[%s2768_s4 + $0x68] sm:$0xff]  }
 0x629   :  { %1885 = vmatprep.subr.bf16.mxu0 %v2057_v37 }
 0x62a   :  { %v1130_v43 = vadd.f32 %v1126_v38, %v2430_v54  ;;  %v1131_v34 = vadd.f32 %v1127_v39, %v2432_v55  ;;  %v1132_v44 = vadd.f32 %v1128_v40, %v2434_v56  ;;  %v1129_v46 = vadd.f32 %v1125_v41, %v2436_v57  ;;  %v2058_v38 = vld [vmem:[%s2768_s4 + $0x70] sm:$0xff]   ;;  %1886 = vmatpush3.bf16.msra.mxu0 %v2057_v37  ;;  %v2059_v39 = vld [vmem:[%s2768_s4 + $0x78] sm:$0xff]  }
 0x62b   :  { %1887 = vmatprep.subr.bf16.mxu0 %v2058_v38 }
 0x62c   :  { %v2598_v51 = vmax.f32 %v1130_v43, 0.0  ;;  %v2600_v53 = vmax.f32 %v1131_v34, 0.0  ;;  %v2602_v32 = vmax.f32 %v1132_v44, 0.0  ;;  %v2604_v50 = vmax.f32 %v1129_v46, 0.0 }
 0x62e   :  { %v1989_v54 = vpack.i.bf16 %v2602_v32, %v2600_v53  ;;  %v1984_v55 = vpack.i.bf16 %v2598_v51, %v2604_v50  ;;  %v1184_v56 = vrot.slane %v2600_v53, 1  ;;  %v1186_v57 = vrot.slane %v2602_v32, 1  ;;  %1888 = vmatpush3.bf16.msra.mxu0 %v2058_v38 }
 0x62f   :  { %v1183_v52 = vrot.slane %v2604_v50, 1  ;;  %v1185_v27 = vrot.slane %v2598_v51, 1  ;;  %v1174_v62 = vrot.slane %v2602_v32, 7  ;;  %v1172_v63 = vrot.slane %v2600_v53, 7  ;;  %1889 = vmatprep.subr.bf16.mxu0 %v2059_v39 }
 0x630   :  { %1990 = vrot.lane.b32.xlu1 %v1989_v54, %s2100_s23  ;;  %1985 = vrot.lane.b32.xlu0 %v1984_v55, %s2100_s23  ;;  %v1188_v42 = vsel %vm228_vm0, %v1184_v56, %v1186_v57  ;;  %v1190_v47 = vsel %vm228_vm0, %v1186_v57, %v1184_v56  ;;  %v1173_v2 = vrot.slane %v2598_v51, 7  ;;  %v1171_v0 = vrot.slane %v2604_v50, 7 }
 0x631   :  { %v1194_v48 = vsel %vm43_vm1, %v1190_v47, 0.0  ;;  %v1187_v49 = vsel %vm228_vm0, %v1183_v52, %v1185_v27  ;;  %v1189_v58 = vsel %vm228_vm0, %v1185_v27, %v1183_v52  ;;  %v1178_v6 = vsel %vm215_vm2, %v1174_v62, %v1172_v63 }
 0x632   :  { %v1999_v59 = vpack.i.bf16 %v1194_v48, %v1188_v42  ;;  %v1192_v60 = vsel %vm43_vm1, %v1189_v58, 0.0  ;;  %v1177_v8 = vsel %vm215_vm2, %v1173_v2, %v1171_v0  ;;  %v1176_v11 = vsel %vm215_vm2, %v1172_v63, %v1174_v62  ;;  %1890 = vmatpush3.bf16.msra.mxu0 %v2059_v39  ;;  %v2061_v39 = vld [vmem:[%s2768_s4 + $0x88] sm:$0xff]  }
 0x633   :  { %v1994_v61 = vpack.i.bf16 %v1192_v60, %v1187_v49  ;;  %v1175_v12 = vsel %vm215_vm2, %v1171_v0, %v1173_v2  ;;  %v1181_v15 = vsel %vm40_vm3, %v1178_v6, 0.0  ;;  %v1179_v16 = vsel %vm40_vm3, %v1177_v8, 0.0 }
 0x634   :  { %2000 = vrot.lane.b32.xlu1 %v1999_v59, %s2101_s29 }
 0x635   :  { %1995 = vrot.lane.b32.xlu0 %v1994_v61, %s2101_s29 }
 0x6a2   :  { %v1991_v1 = vpop.permute.xlu1 %1990  ;;  %v1986_v3 = vpop.permute.xlu0 %1985 }
 0x6a3   :  { %v1993_v5 = vunpack.i.h.bf16 %v1991_v1  ;;  %v1992_v4 = vunpack.i.l.bf16 %v1991_v1  ;;  %v1988_v9 = vunpack.i.h.bf16 %v1986_v3  ;;  %v1987_v10 = vunpack.i.l.bf16 %v1986_v3 }
 0x6a5   :  { %v1229_v20 = vsel %vm66_vm4, %v1181_v15, %v1992_v4  ;;  %v1230_v21 = vsel %vm66_vm4, %v1176_v11, %v1993_v5  ;;  %v1227_v24 = vsel %vm66_vm4, %v1179_v16, %v1987_v10  ;;  %v1228_v26 = vsel %vm66_vm4, %v1175_v12, %v1988_v9 }
 0x6a6   :  { %v2001_v13 = vpop.permute.xlu1 %2000 }
 0x6a7   :  { %v2003_v17 = vunpack.i.h.bf16 %v2001_v13  ;;  %v2002_v18 = vunpack.i.l.bf16 %v2001_v13  ;;  %v1996_v19 = vpop.permute.xlu0 %1995 }
 0x6a8   :  { %v1998_v22 = vunpack.i.h.bf16 %v1996_v19  ;;  %v1997_v23 = vunpack.i.l.bf16 %v1996_v19 }
 0x6a9   :  { %v1233_v29 = vsel %vm273_vm5, %v1229_v20, %v2002_v18  ;;  %v1234_v25 = vsel %vm273_vm5, %v1230_v21, %v2003_v17  ;;  %v1711_v18 = vld [vmem:[%s2766_s2 + $0x2] sm:$0x1] }
 0x6aa   :  { %v1236_v30 = vpack.c.bf16 %v1234_v25, %v1233_v29  ;;  %v1231_v31 = vsel %vm273_vm5, %v1227_v24, %v1997_v23  ;;  %v1232_v33 = vsel %vm273_vm5, %v1228_v26, %v1998_v22  ;;  %v1712_v21 = vld [vmem:[%s2767_s3 + $0x2] sm:$0x1] }
 0x6ab   :  { %v1235_v35 = vpack.c.bf16 %v1232_v33, %v1231_v31  ;;  %v2060_v24 = vld [vmem:[%s2768_s4 + $0x80] sm:$0xff]  }
 0x6ac   :  { %1891 = vmatprep.subr.bf16.mxu0 %v2060_v24 }
 0x6ad   :  { %1879 = vmatprep.mubr.msk.bf16.mxu1 %vm316_vm6, %v1235_v35  ;;  %1892 = vmatpush3.bf16.msra.mxu0 %v2060_v24 }
 0x6ae   :  { %1880 = vmatmul.mubr.msk.bf16.vlgmr.msra.gmra.mrb[8].mxu1 %vm316_vm6, %v1236_v30  ;;  %1893 = vmatprep.subr.bf16.mxu0 %v2061_v39 }
 0x6b1   :  { %1894 = vmatpush3.bf16.msra.mxu0 %v2061_v39 }
 0x781   :  { %v1881_v40 = vpop.f32.mrb[8].mxu1 }
 0x782   :  { %v1313_v41 = vpop.f32.mrb[9].mxu1  ;;  %v1343_v46 = vmul.f32 %v1881_v40, %v1881_v40  ;;  %v1331_v57 = vsel %vm66_vm4, %v1881_v40, 0.0 }
 0x783   :  { %v1341_v43 = vmul.f32 %v1313_v41, %v1313_v41  ;;  %v1882_v34 = vpop.f32.mrb[10].mxu1  ;;  %v1328_v28 = vsel %vm66_vm4, %v1313_v41, 0.0 }
 0x784   :  { %v1316_v44 = vpop.f32.mrb[11].mxu1  ;;  %v1344_v27 = vmul.f32 %v1882_v34, %v1882_v34  ;;  %v1348_v49 = vsel %vm66_vm4, %v1343_v46, 0.0  ;;  %v1333_v58 = vsel %vm66_vm4, %v1882_v34, 0.0 }
 0x785   :  { %v1329_v54 = vsel %vm66_vm4, %v1316_v44, 0.0  ;;  %v1342_v55 = vmul.f32 %v1316_v44, %v1316_v44  ;;  %v1345_v52 = vsel %vm66_vm4, %v1341_v43, 0.0 }
 0x786   :  { %v1330_v56 = vadd.f32 %v1329_v54, %v1328_v28  ;;  %v1350_v61 = vsel %vm66_vm4, %v1344_v27, 0.0 }
 0x787   :  { %v1346_v42 = vsel %vm66_vm4, %v1342_v55, 0.0 }
 0x788   :  { %v1332_v47 = vadd.f32 %v1331_v57, %v1330_v56  ;;  %v1347_v48 = vadd.f32 %v1346_v42, %v1345_v52 }
 0x78a   :  { %v1334_v59 = vadd.f32 %v1333_v58, %v1332_v47  ;;  %v1349_v60 = vadd.f32 %v1348_v49, %v1347_v48 }
 0x78c   :  { %v1335_v62 = vrot.slane %v1334_v59, 4  ;;  %v1351_v63 = vadd.f32 %v1350_v61, %v1349_v60 }
 0x78e   :  { %v1336_v2 = vadd.f32 %v1335_v62, %v1334_v59  ;;  %v1352_v0 = vrot.slane %v1351_v63, 4 }
 0x790   :  { %v1337_v1 = vrot.slane %v1336_v2, 2  ;;  %v1353_v3 = vadd.f32 %v1352_v0, %v1351_v63 }
 0x792   :  { %v1338_v5 = vadd.f32 %v1337_v1, %v1336_v2  ;;  %v1354_v4 = vrot.slane %v1353_v3, 2 }
 0x794   :  { %v1339_v6 = vrot.slane %v1338_v5, 1  ;;  %v1355_v8 = vadd.f32 %v1354_v4, %v1353_v3 }
 0x796   :  { %v1340_v9 = vadd.f32 %v1339_v6, %v1338_v5  ;;  %v1356_v10 = vrot.slane %v1355_v8, 1 }
 0x798   :  { %v1357_v11 = vadd.f32 %v1356_v10, %v1355_v8  ;;  %v1358_v12 = vmul.f32 0.03125, %v1340_v9 }
 0x79a   :  { %v1359_v13 = vmul.f32 0.03125, %v1357_v11  ;;  %v1360_v15 = vmul.f32 %v1358_v12, %v1358_v12 }
 0x79c   :  { %v1361_v16 = vsub.f32 %v1359_v13, %v1360_v15 }
 0x79e   :  { %v1362_v17 = vadd.f32 1e-05, %v1361_v16 }
 0x7a0   :  { %2072 = vrsqrt.f32 %v1362_v17 }
 0x7aa   :  { %v2073_v19 = vpop.eup %2072 }
 0x7ab   :  { %v1364_v20 = vmul.f32 %v2073_v19, %v1711_v18 }
 0x7ad   :  { %v1369_v22 = vrot.slane %v1364_v20, %v2293_v45  ;;  %v1375_v23 = vmul.f32 %v1364_v20, %v1358_v12 }
 0x7af   :  { %v1372_v26 = vmul.f32 %v1369_v22, %v1316_v44  ;;  %v1376_v29 = vsub.f32 %v1712_v21, %v1375_v23  ;;  %v1373_v25 = vmul.f32 %v1881_v40, %v1369_v22  ;;  %v1374_v30 = vmul.f32 %v1882_v34, %v1369_v22 }
 0x7b0   :  { %v1371_v31 = vmul.f32 %v1369_v22, %v1313_v41 }
 0x7b1   :  { %v1381_v33 = vrot.slane %v1376_v29, %v2293_v45 }
 0x7b3   :  { %v1384_v35 = vadd.f32 %v1381_v33, %v1372_v26  ;;  %v1385_v36 = vadd.f32 %v1381_v33, %v1373_v25  ;;  %v1386_v37 = vadd.f32 %v1381_v33, %v1374_v30  ;;  %v1383_v38 = vadd.f32 %v1381_v33, %v1371_v31 }
 0x7b5   :  { %v1388_v43 = vmax.f32 %v1384_v35, 0.0  ;;  %v1389_v46 = vmax.f32 %v1385_v36, 0.0  ;;  %v1390_v28 = vmax.f32 %v1386_v37, 0.0  ;;  %v1387_v44 = vmax.f32 %v1383_v38, 0.0 }
 0x7b7   :  { %v1393_v40 = vrot.slane %v1388_v43, 7  ;;  %v1405_v34 = vrot.slane %v1388_v43, 1  ;;  %v2009_v41 = vpack.i.bf16 %v1390_v28, %v1389_v46  ;;  %v2004_v54 = vpack.i.bf16 %v1388_v43, %v1387_v44 }
 0x7b8   :  { %v1404_v55 = vrot.slane %v1389_v46, 1  ;;  %v1406_v56 = vrot.slane %v1390_v28, 1  ;;  %v1403_v57 = vrot.slane %v1387_v44, 1  ;;  %v1394_v52 = vrot.slane %v1390_v28, 7 }
 0x7b9   :  { %2010 = vrot.lane.b32.xlu1 %v2009_v41, %s2100_s23  ;;  %2005 = vrot.lane.b32.xlu0 %v2004_v54, %s2100_s23  ;;  %v1392_v27 = vrot.slane %v1389_v46, 7  ;;  %v1391_v42 = vrot.slane %v1387_v44, 7 }
 0x7ba   :  { %v1408_v47 = vsel %vm228_vm0, %v1404_v55, %v1406_v56  ;;  %v1410_v48 = vsel %vm228_vm0, %v1406_v56, %v1404_v55  ;;  %v1407_v49 = vsel %vm228_vm0, %v1403_v57, %v1405_v34  ;;  %v1409_v58 = vsel %vm228_vm0, %v1405_v34, %v1403_v57 }
 0x7bb   :  { %v1414_v59 = vsel %vm43_vm1, %v1410_v48, 0.0  ;;  %v1412_v60 = vsel %vm43_vm1, %v1409_v58, 0.0  ;;  %v1396_v61 = vsel %vm215_vm2, %v1392_v27, %v1394_v52  ;;  %v1398_v62 = vsel %vm215_vm2, %v1394_v52, %v1392_v27 }
 0x7bc   :  { %v2019_v63 = vpack.i.bf16 %v1414_v59, %v1408_v47  ;;  %v2014_v2 = vpack.i.bf16 %v1412_v60, %v1407_v49  ;;  %v1395_v0 = vsel %vm215_vm2, %v1391_v42, %v1393_v40  ;;  %v1397_v1 = vsel %vm215_vm2, %v1393_v40, %v1391_v42 }
 0x7bd   :  { %v1401_v9 = vsel %vm40_vm3, %v1398_v62, 0.0  ;;  %v1399_v10 = vsel %vm40_vm3, %v1397_v1, 0.0 }
 0x7be   :  { %2020 = vrot.lane.b32.xlu1 %v2019_v63, %s2101_s29  ;;  %2015 = vrot.lane.b32.xlu0 %v2014_v2, %s2101_s29 }
 0x82b   :  { %v2011_v14 = vpop.permute.xlu1 %2010  ;;  %v2006_v3 = vpop.permute.xlu0 %2005 }
 0x82c   :  { %v2013_v5 = vunpack.i.h.bf16 %v2011_v14  ;;  %v2012_v4 = vunpack.i.l.bf16 %v2011_v14  ;;  %v2008_v6 = vunpack.i.h.bf16 %v2006_v3  ;;  %v2007_v8 = vunpack.i.l.bf16 %v2006_v3 }
 0x82e   :  { %v1449_v18 = vsel %vm66_vm4, %v1401_v9, %v2012_v4  ;;  %v1450_v19 = vsel %vm66_vm4, %v1396_v61, %v2013_v5  ;;  %v1447_v20 = vsel %vm66_vm4, %v1399_v10, %v2007_v8  ;;  %v1448_v21 = vsel %vm66_vm4, %v1395_v0, %v2008_v6  ;;  %v1725_v6 = vld [vmem:[%s2769_s5 + $0x2] sm:$0x1]  ;;  %s2102_s5 = smov [#allocation2]  }
 0x82f   :  { %v1726_v10 = vld [vmem:[%s2770_s6 + $0x2] sm:$0x1]  ;;  %s1624_s14 = sshll.u32 %s2102_s5, 4  ;;  %s1625_s14 = int_to_ptr.vmem [resolvable:$true] %s1624_s14 }
 0x830   :  { %v2021_v11 = vpop.permute.xlu1 %2020  ;;  %v2016_v12 = vpop.permute.xlu0 %2015  ;;  %s2076_s6 = scalar_lea.vmem %s1625_s14, 512  ;;  %p2081_p1 = scmp.lt.s32.totalorder %s1625_s14, %s1625_s14 }
 0x831   :  { %v2023_v13 = vunpack.i.h.bf16 %v2021_v11  ;;  %v2022_v15 = vunpack.i.l.bf16 %v2021_v11  ;;  %v2018_v16 = vunpack.i.h.bf16 %v2016_v12  ;;  %v2017_v17 = vunpack.i.l.bf16 %v2016_v12  ;;  %p2077_p0 = scmp.ne.s32.totalorder %s1625_s14, %s2076_s6  ;;  %p2082_p2 = scmp.lt.s32.totalorder %s2076_s6, %s2076_s6 }
 0x833   :  { %v1453_v22 = vsel %vm273_vm5, %v1449_v18, %v2022_v15  ;;  %v1454_v23 = vsel %vm273_vm5, %v1450_v19, %v2023_v13  ;;  %v1451_v7 = vsel %vm273_vm5, %v1447_v20, %v2017_v17  ;;  %v1452_v24 = vsel %vm273_vm5, %v1448_v21, %v2018_v16  ;;  %p2083_p3 = por %p2082_p2, %p2081_p1 }
 0x834   :  { %v1456_v26 = vpack.c.bf16 %v1454_v23, %v1453_v22  ;;  %v1455_v29 = vpack.c.bf16 %v1452_v24, %v1451_v7 }
 0x835   :  { %p2084_p4 = pnand %p2083_p3, %p2077_p0 }
 0x836   :  { %1895 = vmatprep.mubr.msk.bf16.mxu0 %vm316_vm6, %v1455_v29 }
 0x837   :  { %1896 = vmatmul.mubr.msk.bf16.vlgmr.msra.gmra.mrb[12].mxu0 %vm316_vm6, %v1456_v26 }
 0x90a   :  { %v1897_v25 = vpop.f32.mrb[12].mxu0 }
 0x90b   :  { %v1533_v30 = vpop.f32.mrb[13].mxu0  ;;  %v1563_v36 = vmul.f32 %v1897_v25, %v1897_v25  ;;  %v1551_v46 = vsel %vm66_vm4, %v1897_v25, 0.0 }
 0x90c   :  { %v1561_v31 = vmul.f32 %v1533_v30, %v1533_v30  ;;  %v1898_v33 = vpop.f32.mrb[14].mxu0  ;;  %v1548_v37 = vsel %vm66_vm4, %v1533_v30, 0.0 }
 0x90d   :  { %v1536_v35 = vpop.f32.mrb[15].mxu0  ;;  %v1564_v44 = vmul.f32 %v1898_v33, %v1898_v33  ;;  %v1568_v54 = vsel %vm66_vm4, %v1563_v36, 0.0  ;;  %v1553_v55 = vsel %vm66_vm4, %v1898_v33, 0.0 }
 0x90e   :  { %v1549_v38 = vsel %vm66_vm4, %v1536_v35, 0.0  ;;  %v1562_v39 = vmul.f32 %v1536_v35, %v1536_v35  ;;  %v1565_v28 = vsel %vm66_vm4, %v1561_v31, 0.0 }
 0x90f   :  { %v1550_v43 = vadd.f32 %v1549_v38, %v1548_v37  ;;  %v1570_v52 = vsel %vm66_vm4, %v1564_v44, 0.0 }
 0x910   :  { %v1566_v40 = vsel %vm66_vm4, %v1562_v39, 0.0 }
 0x911   :  { %v1552_v34 = vadd.f32 %v1551_v46, %v1550_v43  ;;  %v1567_v41 = vadd.f32 %v1566_v40, %v1565_v28 }
 0x913   :  { %v1554_v56 = vadd.f32 %v1553_v55, %v1552_v34  ;;  %v1569_v57 = vadd.f32 %v1568_v54, %v1567_v41 }
 0x915   :  { %v1555_v27 = vrot.slane %v1554_v56, 4  ;;  %v1571_v42 = vadd.f32 %v1570_v52, %v1569_v57 }
 0x917   :  { %v1556_v47 = vadd.f32 %v1555_v27, %v1554_v56  ;;  %v1572_v48 = vrot.slane %v1571_v42, 4 }
 0x919   :  { %v1557_v49 = vrot.slane %v1556_v47, 2  ;;  %v1573_v58 = vadd.f32 %v1572_v48, %v1571_v42 }
 0x91b   :  { %v1558_v59 = vadd.f32 %v1557_v49, %v1556_v47  ;;  %v1574_v60 = vrot.slane %v1573_v58, 2 }
 0x91d   :  { %v1559_v61 = vrot.slane %v1558_v59, 1  ;;  %v1575_v62 = vadd.f32 %v1574_v60, %v1573_v58 }
 0x91f   :  { %v1560_v63 = vadd.f32 %v1559_v61, %v1558_v59  ;;  %v1576_v2 = vrot.slane %v1575_v62, 1 }
 0x921   :  { %v1577_v0 = vadd.f32 %v1576_v2, %v1575_v62  ;;  %v1578_v1 = vmul.f32 0.03125, %v1560_v63 }
 0x923   :  { %v1579_v14 = vmul.f32 0.03125, %v1577_v0  ;;  %v1580_v3 = vmul.f32 %v1578_v1, %v1578_v1 }
 0x925   :  { %v1581_v5 = vsub.f32 %v1579_v14, %v1580_v3 }
 0x927   :  { %v1582_v4 = vadd.f32 1e-05, %v1581_v5 }
 0x929   :  { %2074 = vrsqrt.f32 %v1582_v4 }
 0x933   :  { %v2075_v8 = vpop.eup %2074 }
 0x934   :  { %v1584_v9 = vmul.f32 %v2075_v8, %v1725_v6 }
 0x936   :  { %v1589_v11 = vrot.slane %v1584_v9, %v2293_v45  ;;  %v1595_v12 = vmul.f32 %v1584_v9, %v1578_v1 }
 0x938   :  { %v1591_v13 = vmul.f32 %v1589_v11, %v1533_v30  ;;  %v1592_v15 = vmul.f32 %v1589_v11, %v1536_v35  ;;  %v1593_v16 = vmul.f32 %v1897_v25, %v1589_v11  ;;  %v1594_v17 = vmul.f32 %v1898_v33, %v1589_v11 }
 0x939   :  { %v1596_v18 = vsub.f32 %v1726_v10, %v1595_v12 }
 0x93b   :  { %v1601_v19 = vrot.slane %v1596_v18, %v2293_v45 }
 0x93d   :  { %v1603_v20 = vadd.f32 %v1601_v19, %v1591_v13  ;;  %v1604_v21 = vadd.f32 %v1601_v19, %v1592_v15  ;;  %v1605_v22 = vadd.f32 %v1601_v19, %v1593_v16  ;;  %v1606_v23 = vadd.f32 %v1601_v19, %v1594_v17 }
 0x93f   :  { %v1608_v7 = vadd.f32 %v1604_v21, %v2598_v51  ;;  %v1607_v24 = vadd.f32 %v1603_v20, %v2604_v50  ;;  %v1609_v26 = vadd.f32 %v1605_v22, %v2600_v53  ;;  %v1610_v29 = vadd.f32 %v1606_v23, %v2602_v32 }
 0x941   :  { %v1612_v30 = vmax.f32 %v1608_v7, 0.0  ;;  %v1611_v25 = vmax.f32 %v1607_v24, 0.0  ;;  %v1613_v31 = vmax.f32 %v1609_v26, 0.0  ;;  %v1614_v33 = vmax.f32 %v1610_v29, 0.0 }
 0x943   :  { %1616 = vst.msk [vmem:[#allocation2 + $0x8] sm:$0xff] %vm66_vm4, %v1612_v30  ;;  %1615 = vst.msk [vmem:[#allocation2] sm:$0xff] %vm66_vm4, %v1611_v25 }
 0x944   :  { %1617 = vst.msk [vmem:[#allocation2 + $0x10] sm:$0xff] %vm66_vm4, %v1613_v31  ;;  %1618 = vst.msk [vmem:[#allocation2 + $0x18] sm:$0xff] %vm66_vm4, %v1614_v33 }
 0x945   :  { %2087 = shalt.err (!%p2084_p4)
}
 0x946   :  { %s2088_s17 = scalar_lea.hbm %s2774_s10, 512 }
 0x947   :  { %p2089_p5 = scmp.ne.s32.totalorder %s2774_s10, %s2088_s17  ;;  %p2092_p6 = scmp.lt.u32.totalorder %s2088_s17, %s2774_s10 }
 0x949   :  { %p2094_p7 = pnand %p2092_p6, %p2089_p5 }
 0x94b   :  { %2097 = shalt.err (!%p2094_p7)
}
 0x94c   :  { %s2103_s1 = smov 128   ;;  %s2104_s20 = smov 8  }
 0x94d   :  { %1630 = dma.vmem_to_hbm [thread:$0]  %s1625_s14, 512, %s2774_s10, [#allocation3], %s2103_s1, %s2103_s1, %s2104_s20  }
 0x94e   :  { %2098 = dma.done.wait [#allocation3], 512  }
 0x94f   :  { %2099 = vsyncadd [#allocation3], 4294966784 }
 0x950   :  { %1634 = vsyncpa [#allocation3], 1 }

</bundles_post_ra>
